<compile_context>
chip_gen: v5e
topology: v5e:2x2
jax: 0.10.0
libtpu: 0.0.40
codegen_flags: <defaults>
</compile_context>

<pallas_src>
import functools

import jax
import jax.numpy as jnp
from jax.experimental import pallas as pl
from jax.experimental.pallas import tpu as pltpu

BN_EPS = 1e-5


def _round_up(v, m):
    return (v + m - 1) // m * m


def _pick_batch_tile(n, per_image_bytes, vmem_budget=24 << 20):
    """Images per grid step: amortize the ~0.35 us/step overhead for big batches while
    keeping several parallel steps (>= 2 when N > 1) so v7x's two TensorCores both get
    work; capped by a conservative VMEM budget (fits v7x's 64 MiB phys / 32 MiB scoped
    with double-buffered in/out blocks). Must divide n so every step is full."""
    cap = max(1, int(vmem_budget // max(per_image_bytes, 1)))
    target = min(cap, max(1, n // 8)) if n > 1 else 1
    for bt in range(target, 0, -1):
        if n % bt == 0:
            return bt
    return 1


def _conv_stats_kernel(x_ref, w_ref, y_ref, stat_ref, patch_ref, *,
                       kh, kw, oh, ow, stride, oc, b_tile):
    """Fused im2col conv + per-tile BN partial statistics.

    x_ref:     (B, Hp, Wp, C)      padded NHWC images
    w_ref:     (KH*KW*C, OC_pad)   conv weight, tap-major/channel-minor rows, OC->x8
    y_ref:     (B, OC, OH*OW)      conv output, channel-major, spatial on lanes
    stat_ref:  (1, OC, 2)          per-channel [sum, sumsq] over this batch tile
    patch_ref: (OH*OW, KH*KW*C)    VMEM scratch: im2col slab for one image
    """
    c = x_ref.shape[-1]
    s = oh * ow
    w = w_ref[...]                       # resident across the whole batch tile

    tsum = jnp.zeros((oc, 1), jnp.float32)
    tsq = jnp.zeros((oc, 1), jnp.float32)
    for b in range(b_tile):              # static unroll over images in this tile
        x = x_ref[b]                     # (Hp, Wp, C)
        # Build the (S, K) patch slab once into scratch (relayout paid explicitly,
        # once), then ONE K = KH*KW*C contraction feeds the MXU instead of KH*KW
        # tiny K=C dots + VPU accumulates.
        for idx in range(kh * kw):
            i, j = idx // kw, idx % kw
            xs = x[i:i + stride * oh:stride, j:j + stride * ow:stride, :]  # (OH,OW,C)
            patch_ref[:, idx * c:(idx + 1) * c] = xs.reshape(s, c)
        acc = jnp.dot(patch_ref[...], w,
                      preferred_element_type=jnp.float32)   # (S, OC_pad), f32 acc
        # TODO(synk): orient as (OC,K)x(K,S) to skip even this tiny transpose once the
        # NCHW (C,OH,OW)->(C,OH*OW) in-kernel relayout is verified to lower.
        yt = acc.T[:oc, :]               # (OC, S): ~8 KB XLU transpose, lane-dense S
        y_ref[b] = yt.astype(y_ref.dtype)
        # Stats in f32 straight from the accumulator (stays exact if y is ever bf16).
        tsum = tsum + jnp.sum(yt, axis=1, keepdims=True)
        tsq = tsq + jnp.sum(yt * yt, axis=1, keepdims=True)
    stat_ref[0, :, 0:1] = tsum
    stat_ref[0, :, 1:2] = tsq


def _bn_apply_kernel(y_ref, scale_ref, shift_ref, o_ref):
    # y/o: (B, OC, S); scale/shift: (OC, 1). One FMA per element, f32 VPU math
    # (v5e has no bf16 VPU), lane-dense loads/stores, in-place via aliasing.
    o_ref[...] = y_ref[...].astype(jnp.float32) * scale_ref[...] + shift_ref[...]


def conv_block_forward(x, conv_w, conv_b, bn_gamma, bn_beta, *, stride, padding):
    """x: (N, C, H, W) NCHW. Returns (N, OC, OH, OW) NCHW float32 (training-mode
    Conv2d + BatchNorm2d forward with batch statistics)."""
    del conv_b  # exactly cancelled by training-mode BN mean subtraction
    n, c, h, w_in = x.shape
    oc, _, kh, kw = conv_w.shape
    oh = (h + 2 * padding - kh) // stride + 1
    ow = (w_in + 2 * padding - kw) // stride + 1
    s = oh * ow
    hp, wp = h + 2 * padding, w_in + 2 * padding
    k = kh * kw * c
    oc_pad = _round_up(oc, 8)            # sublane multiple only; no 128-lane padding
    f32 = jnp.float32

    # NHWC + spatial padding. Patches are never materialized in HBM (im2col is fused).
    # TODO(synk): drop this input relayout (keep NCHW / flattened rows, or use
    # allow_input_fusion) once the in-kernel NCHW patch relayout is verified to lower;
    # it costs one extra HBM pass of the input per call.
    xp = jnp.pad(jnp.transpose(x.astype(f32), (0, 2, 3, 1)),
                 ((0, 0), (padding, padding), (padding, padding), (0, 0)))
    # (OC,C,KH,KW) -> (KH,KW,C,OC) -> (K, OC_pad): rows tap-major/channel-minor to
    # match the in-kernel patch slab columns.
    w_k = jnp.transpose(conv_w.astype(f32), (2, 3, 1, 0)).reshape(k, oc)
    w_k = jnp.pad(w_k, ((0, 0), (0, oc_pad - oc)))

    per_image_bytes = 2 * 4 * (hp * wp * c + oc * s)   # double-buffered in + out blocks
    b_tile = _pick_batch_tile(n, per_image_bytes)
    num_tiles = n // b_tile

    conv_kernel = functools.partial(
        _conv_stats_kernel, kh=kh, kw=kw, oh=oh, ow=ow, stride=stride, oc=oc,
        b_tile=b_tile)

    # Pass 1: conv (fused im2col, one K = KH*KW*C MXU dot per image) + per-tile stats.
    # TODO(synk): for large OH*OW also tile the spatial axis (KH-1 row halo) and store
    # y as bf16 to halve the y HBM round-trip; unnecessary at these shapes.
    y, stats = pl.pallas_call(
        conv_kernel,
        out_shape=(jax.ShapeDtypeStruct((n, oc, s), f32),
                   jax.ShapeDtypeStruct((num_tiles, oc, 2), f32)),
        grid_spec=pltpu.PrefetchScalarGridSpec(
            num_scalar_prefetch=0,
            grid=(num_tiles,),
            in_specs=[
                pl.BlockSpec((b_tile, hp, wp, c), lambda t: (t, 0, 0, 0)),
                pl.BlockSpec((k, oc_pad), lambda t: (0, 0)),
            ],
            out_specs=(
                pl.BlockSpec((b_tile, oc, s), lambda t: (t, 0, 0)),
                pl.BlockSpec((1, oc, 2), lambda t: (t, 0, 0)),
            ),
            scratch_shapes=[pltpu.VMEM((s, k), f32)]),
        compiler_params=pltpu.CompilerParams(
            dimension_semantics=("parallel",)),   # batch tiles over v7x's 2 TCs
    )(xp, w_k)

    # Global batch statistics (tiny (OC, 2) math in plain JAX) folded into one
    # scale/shift pair so pass 2 is a single FMA per element.
    m_total = float(n * s)
    tot = jnp.sum(stats, axis=0)                                  # (OC, 2)
    mean = tot[:, 0] / m_total
    # TODO(synk): E[x^2]-E[x]^2 can cancel for very large N*OH*OW; use a centered or
    # compensated accumulation there. The clamp keeps rsqrt well-defined.
    var = jnp.maximum(tot[:, 1] / m_total - mean * mean, 0.0)     # biased (training fwd)
    scale = bn_gamma.astype(f32) * jax.lax.rsqrt(var + BN_EPS)
    shift = bn_beta.astype(f32) - mean * scale

    # Pass 2: normalize in place (aliased) on lane-dense (OC, OH*OW) blocks.
    out_flat = pl.pallas_call(
        _bn_apply_kernel,
        out_shape=jax.ShapeDtypeStruct((n, oc, s), f32),
        grid_spec=pltpu.PrefetchScalarGridSpec(
            num_scalar_prefetch=0,
            grid=(num_tiles,),
            in_specs=[
                pl.BlockSpec((b_tile, oc, s), lambda t: (t, 0, 0)),
                pl.BlockSpec((oc, 1), lambda t: (0, 0)),
                pl.BlockSpec((oc, 1), lambda t: (0, 0)),
            ],
            out_specs=pl.BlockSpec((b_tile, oc, s), lambda t: (t, 0, 0))),
        input_output_aliases={0: 0},   # normalize y in place; no second N*OC*S buffer
        compiler_params=pltpu.CompilerParams(
            dimension_semantics=("parallel",)),
    )(y, scale.reshape(oc, 1), shift.reshape(oc, 1))

    # (N, OC, OH*OW) -> (N, OC, OH, OW): pure reshape, no transpose.
    return out_flat.reshape(n, oc, oh, ow)


def _reference(x, conv_w, conv_b, bn_gamma, bn_beta, *, stride, padding):
    y = jax.lax.conv_general_dilated(
        x.astype(jnp.float32), conv_w.astype(jnp.float32),
        window_strides=(stride, stride),
        padding=((padding, padding), (padding, padding)),
        dimension_numbers=("NCHW", "OIHW", "NCHW"),
    ) + conv_b.reshape(1, -1, 1, 1)
    mean = jnp.mean(y, axis=(0, 2, 3), keepdims=True)
    var = jnp.mean((y - mean) ** 2, axis=(0, 2, 3), keepdims=True)
    y_hat = (y - mean) / jnp.sqrt(var + BN_EPS)
    return y_hat * bn_gamma.reshape(1, -1, 1, 1) + bn_beta.reshape(1, -1, 1, 1)


if __name__ == "__main__":
    # Shapes consistent with conv_block(in_channels=4, out_channels=8,
    # kernel_size=3, stride=1, padding=1)
    N, C, H, W = 2, 4, 16, 16
    OC, KH, KW = 8, 3, 3
    STRIDE, PADDING = 1, 1

    key = jax.random.PRNGKey(0)
    kx, kw_, kb = jax.random.split(key, 3)
    x = jax.random.normal(kx, (N, C, H, W), dtype=jnp.float32)
    conv_w = 0.1 * jax.random.normal(kw_, (OC, C, KH, KW), dtype=jnp.float32)
    conv_b = 0.1 * jax.random.normal(kb, (OC,), dtype=jnp.float32)
    bn_gamma = jnp.ones((OC,), dtype=jnp.float32)   # PyTorch BN default init
    bn_beta = jnp.zeros((OC,), dtype=jnp.float32)

    fwd = jax.jit(conv_block_forward, static_argnames=("stride", "padding"))
    out = fwd(x, conv_w, conv_b, bn_gamma, bn_beta, stride=STRIDE, padding=PADDING)
    out = jax.block_until_ready(out)

    ref = _reference(x, conv_w, conv_b, bn_gamma, bn_beta,
                     stride=STRIDE, padding=PADDING)
    assert out.shape == (N, OC, H, W)
    err = float(jnp.max(jnp.abs(out - ref)))
    assert err < 1e-3, f"mismatch vs reference: {err}"
    print("KERNEL_OK")
</pallas_src>

<mosaic_0001>
module attributes {stable_mosaic.version = 11 : i64} {
  func.func @_conv_stats_kernel(%arg0: i32, %arg1: memref<1x18x18x4xf32, #tpu.memory_space<vmem>>, %arg2: memref<36x8xf32, #tpu.memory_space<vmem>>, %arg3: memref<1x8x256xf32, #tpu.memory_space<vmem>>, %arg4: memref<1x8x2xf32, #tpu.memory_space<vmem>>, %arg5: memref<256x36xf32, #tpu.memory_space<vmem>>) attributes {dimension_semantics = [#tpu.dimension_semantics<parallel>], iteration_bounds = array<i64: 2>, scalar_prefetch = 0 : i64, scratch_operands = 1 : i64, tpu.core_type = #tpu.core_type<tc>, window_params = [{transform_indices = @transform_0, window_bounds = array<i64: 1, 18, 18, 4>}, {pipeline_mode = #tpu.pipeline_mode<synchronous>, transform_indices = @transform_1, window_bounds = array<i64: 36, 8>}, {transform_indices = @transform_2, window_bounds = array<i64: 1, 8, 256>}, {transform_indices = @transform_3, window_bounds = array<i64: 1, 8, 2>}]} {
    %c0 = arith.constant 0 : index
    %c0_0 = arith.constant 0 : index
    %0 = vector.load %arg2[%c0, %c0_0] : memref<36x8xf32, #tpu.memory_space<vmem>>, vector<36x8xf32>
    %cst = arith.constant 0.000000e+00 : f32
    %1 = vector.broadcast %cst : f32 to vector<8x1xf32>
    %cst_1 = arith.constant 0.000000e+00 : f32
    %2 = vector.broadcast %cst_1 : f32 to vector<8x1xf32>
    %c0_2 = arith.constant 0 : index
    %c0_3 = arith.constant 0 : index
    %c0_4 = arith.constant 0 : index
    %c0_5 = arith.constant 0 : index
    %3 = vector.load %arg1[%c0_2, %c0_3, %c0_4, %c0_5] : memref<1x18x18x4xf32, #tpu.memory_space<vmem>>, vector<1x18x18x4xf32>
    %4 = vector.shape_cast %3 : vector<1x18x18x4xf32> to vector<18x18x4xf32>
    %5 = vector.extract_strided_slice %4 {offsets = [0, 0, 0], sizes = [16, 16, 4], strides = [1, 1, 1]} : vector<18x18x4xf32> to vector<16x16x4xf32>
    %6 = vector.shape_cast %5 : vector<16x16x4xf32> to vector<256x4xf32>
    %c0_6 = arith.constant 0 : index
    %c0_7 = arith.constant 0 : index
    %7 = vector.load %arg5[%c0_6, %c0_7] : memref<256x36xf32, #tpu.memory_space<vmem>>, vector<256x4xf32>
    tpu.vector_store %arg5[%c0_6, %c0_7], %6 {strides = array<i32>} : memref<256x36xf32, #tpu.memory_space<vmem>>, vector<256x4xf32>,
    %8 = vector.extract_strided_slice %4 {offsets = [0, 1, 0], sizes = [16, 16, 4], strides = [1, 1, 1]} : vector<18x18x4xf32> to vector<16x16x4xf32>
    %9 = vector.shape_cast %8 : vector<16x16x4xf32> to vector<256x4xf32>
    %c0_8 = arith.constant 0 : index
    %c4 = arith.constant 4 : index
    %10 = vector.load %arg5[%c0_8, %c4] : memref<256x36xf32, #tpu.memory_space<vmem>>, vector<256x4xf32>
    tpu.vector_store %arg5[%c0_8, %c4], %9 {strides = array<i32>} : memref<256x36xf32, #tpu.memory_space<vmem>>, vector<256x4xf32>,
    %11 = vector.extract_strided_slice %4 {offsets = [0, 2, 0], sizes = [16, 16, 4], strides = [1, 1, 1]} : vector<18x18x4xf32> to vector<16x16x4xf32>
    %12 = vector.shape_cast %11 : vector<16x16x4xf32> to vector<256x4xf32>
    %c0_9 = arith.constant 0 : index
    %c8 = arith.constant 8 : index
    %13 = vector.load %arg5[%c0_9, %c8] : memref<256x36xf32, #tpu.memory_space<vmem>>, vector<256x4xf32>
    tpu.vector_store %arg5[%c0_9, %c8], %12 {strides = array<i32>} : memref<256x36xf32, #tpu.memory_space<vmem>>, vector<256x4xf32>,
    %14 = vector.extract_strided_slice %4 {offsets = [1, 0, 0], sizes = [16, 16, 4], strides = [1, 1, 1]} : vector<18x18x4xf32> to vector<16x16x4xf32>
    %15 = vector.shape_cast %14 : vector<16x16x4xf32> to vector<256x4xf32>
    %c0_10 = arith.constant 0 : index
    %c12 = arith.constant 12 : index
    %16 = vector.load %arg5[%c0_10, %c12] : memref<256x36xf32, #tpu.memory_space<vmem>>, vector<256x4xf32>
    tpu.vector_store %arg5[%c0_10, %c12], %15 {strides = array<i32>} : memref<256x36xf32, #tpu.memory_space<vmem>>, vector<256x4xf32>,
    %17 = vector.extract_strided_slice %4 {offsets = [1, 1, 0], sizes = [16, 16, 4], strides = [1, 1, 1]} : vector<18x18x4xf32> to vector<16x16x4xf32>
    %18 = vector.shape_cast %17 : vector<16x16x4xf32> to vector<256x4xf32>
    %c0_11 = arith.constant 0 : index
    %c16 = arith.constant 16 : index
    %19 = vector.load %arg5[%c0_11, %c16] : memref<256x36xf32, #tpu.memory_space<vmem>>, vector<256x4xf32>
    tpu.vector_store %arg5[%c0_11, %c16], %18 {strides = array<i32>} : memref<256x36xf32, #tpu.memory_space<vmem>>, vector<256x4xf32>,
    %20 = vector.extract_strided_slice %4 {offsets = [1, 2, 0], sizes = [16, 16, 4], strides = [1, 1, 1]} : vector<18x18x4xf32> to vector<16x16x4xf32>
    %21 = vector.shape_cast %20 : vector<16x16x4xf32> to vector<256x4xf32>
    %c0_12 = arith.constant 0 : index
    %c20 = arith.constant 20 : index
    %22 = vector.load %arg5[%c0_12, %c20] : memref<256x36xf32, #tpu.memory_space<vmem>>, vector<256x4xf32>
    tpu.vector_store %arg5[%c0_12, %c20], %21 {strides = array<i32>} : memref<256x36xf32, #tpu.memory_space<vmem>>, vector<256x4xf32>,
    %23 = vector.extract_strided_slice %4 {offsets = [2, 0, 0], sizes = [16, 16, 4], strides = [1, 1, 1]} : vector<18x18x4xf32> to vector<16x16x4xf32>
    %24 = vector.shape_cast %23 : vector<16x16x4xf32> to vector<256x4xf32>
    %c0_13 = arith.constant 0 : index
    %c24 = arith.constant 24 : index
    %25 = vector.load %arg5[%c0_13, %c24] : memref<256x36xf32, #tpu.memory_space<vmem>>, vector<256x4xf32>
    tpu.vector_store %arg5[%c0_13, %c24], %24 {strides = array<i32>} : memref<256x36xf32, #tpu.memory_space<vmem>>, vector<256x4xf32>,
    %26 = vector.extract_strided_slice %4 {offsets = [2, 1, 0], sizes = [16, 16, 4], strides = [1, 1, 1]} : vector<18x18x4xf32> to vector<16x16x4xf32>
    %27 = vector.shape_cast %26 : vector<16x16x4xf32> to vector<256x4xf32>
    %c0_14 = arith.constant 0 : index
    %c28 = arith.constant 28 : index
    %28 = vector.load %arg5[%c0_14, %c28] : memref<256x36xf32, #tpu.memory_space<vmem>>, vector<256x4xf32>
    tpu.vector_store %arg5[%c0_14, %c28], %27 {strides = array<i32>} : memref<256x36xf32, #tpu.memory_space<vmem>>, vector<256x4xf32>,
    %29 = vector.extract_strided_slice %4 {offsets = [2, 2, 0], sizes = [16, 16, 4], strides = [1, 1, 1]} : vector<18x18x4xf32> to vector<16x16x4xf32>
    %30 = vector.shape_cast %29 : vector<16x16x4xf32> to vector<256x4xf32>
    %c0_15 = arith.constant 0 : index
    %c32 = arith.constant 32 : index
    %31 = vector.load %arg5[%c0_15, %c32] : memref<256x36xf32, #tpu.memory_space<vmem>>, vector<256x4xf32>
    tpu.vector_store %arg5[%c0_15, %c32], %30 {strides = array<i32>} : memref<256x36xf32, #tpu.memory_space<vmem>>, vector<256x4xf32>,
    %c0_16 = arith.constant 0 : index
    %c0_17 = arith.constant 0 : index
    %32 = vector.load %arg5[%c0_16, %c0_17] : memref<256x36xf32, #tpu.memory_space<vmem>>, vector<256x36xf32>
    %cst_18 = arith.constant dense<0.000000e+00> : vector<256x8xf32>
    %33 = tpu.matmul %32, %0, %cst_18 {dimension_numbers = #tpu.dot_dimension_numbers<[1], [0], [0], [1], [0, 0, 1, 1], [], []>} : vector<256x36xf32>, vector<36x8xf32>, vector<256x8xf32> -> vector<256x8xf32>
    %34 = tpu.transpose %33, [1, 0] : vector<256x8xf32> -> vector<8x256xf32>
    %c0_19 = arith.constant 0 : index
    %c0_20 = arith.constant 0 : index
    %c0_21 = arith.constant 0 : index
    %35 = vector.load %arg3[%c0_19, %c0_20, %c0_21] : memref<1x8x256xf32, #tpu.memory_space<vmem>>, vector<1x8x256xf32>
    %36 = vector.shape_cast %35 : vector<1x8x256xf32> to vector<8x256xf32>
    %37 = vector.shape_cast %34 : vector<8x256xf32> to vector<1x8x256xf32>
    tpu.vector_store %arg3[%c0_19, %c0_20, %c0_21], %37 {strides = array<i32>} : memref<1x8x256xf32, #tpu.memory_space<vmem>>, vector<1x8x256xf32>,
    %cst_22 = arith.constant dense<0.000000e+00> : vector<8xf32>
    %38 = vector.multi_reduction <add>, %34, %cst_22 [1] : vector<8x256xf32> to vector<8xf32>
    %39 = vector.shape_cast %38 : vector<8xf32> to vector<8x1xf32>
    %40 = arith.addf %1, %39 : vector<8x1xf32>
    %41 = arith.mulf %34, %34 : vector<8x256xf32>
    %cst_23 = arith.constant dense<0.000000e+00> : vector<8xf32>
    %42 = vector.multi_reduction <add>, %41, %cst_23 [1] : vector<8x256xf32> to vector<8xf32>
    %43 = vector.shape_cast %42 : vector<8xf32> to vector<8x1xf32>
    %44 = arith.addf %2, %43 : vector<8x1xf32>
    %c0_24 = arith.constant 0 : index
    %c0_25 = arith.constant 0 : index
    %c0_26 = arith.constant 0 : index
    %45 = vector.load %arg4[%c0_24, %c0_25, %c0_26] : memref<1x8x2xf32, #tpu.memory_space<vmem>>, vector<1x8x1xf32>
    %46 = vector.shape_cast %45 : vector<1x8x1xf32> to vector<8x1xf32>
    %47 = vector.shape_cast %40 : vector<8x1xf32> to vector<1x8x1xf32>
    tpu.vector_store %arg4[%c0_24, %c0_25, %c0_26], %47 {strides = array<i32>} : memref<1x8x2xf32, #tpu.memory_space<vmem>>, vector<1x8x1xf32>,
    %c0_27 = arith.constant 0 : index
    %c0_28 = arith.constant 0 : index
    %c1 = arith.constant 1 : index
    %48 = vector.load %arg4[%c0_27, %c0_28, %c1] : memref<1x8x2xf32, #tpu.memory_space<vmem>>, vector<1x8x1xf32>
    %49 = vector.shape_cast %48 : vector<1x8x1xf32> to vector<8x1xf32>
    %50 = vector.shape_cast %44 : vector<8x1xf32> to vector<1x8x1xf32>
    tpu.vector_store %arg4[%c0_27, %c0_28, %c1], %50 {strides = array<i32>} : memref<1x8x2xf32, #tpu.memory_space<vmem>>, vector<1x8x1xf32>,
    return
  }
  func.func @transform_0(%arg0: i32) -> (i32, i32, i32, i32) {
    %c0_i32 = arith.constant 0 : i32
    %c0_i32_0 = arith.constant 0 : i32
    %c0_i32_1 = arith.constant 0 : i32
    %c0_i32_2 = arith.constant 0 : i32
    return %arg0, %c0_i32, %c0_i32_0, %c0_i32_1 : i32, i32, i32, i32
  }
  func.func @transform_1(%arg0: i32) -> (i32, i32) {
    %c0_i32 = arith.constant 0 : i32
    %c0_i32_0 = arith.constant 0 : i32
    %c0_i32_1 = arith.constant 0 : i32
    return %c0_i32, %c0_i32_0 : i32, i32
  }
  func.func @transform_2(%arg0: i32) -> (i32, i32, i32) {
    %c0_i32 = arith.constant 0 : i32
    %c0_i32_0 = arith.constant 0 : i32
    %c0_i32_1 = arith.constant 0 : i32
    return %arg0, %c0_i32, %c0_i32_0 : i32, i32, i32
  }
  func.func @transform_3(%arg0: i32) -> (i32, i32, i32) {
    %c0_i32 = arith.constant 0 : i32
    %c0_i32_0 = arith.constant 0 : i32
    %c0_i32_1 = arith.constant 0 : i32
    return %arg0, %c0_i32, %c0_i32_0 : i32, i32, i32
  }
}

module attributes {stable_mosaic.version = 11 : i64} {
  func.func @_bn_apply_kernel(%arg0: i32, %arg1: memref<1x8x256xf32, #tpu.memory_space<vmem>>, %arg2: memref<8x1xf32, #tpu.memory_space<vmem>>, %arg3: memref<8x1xf32, #tpu.memory_space<vmem>>, %arg4: memref<1x8x256xf32, #tpu.memory_space<vmem>>) attributes {dimension_semantics = [#tpu.dimension_semantics<parallel>], iteration_bounds = array<i64: 2>, scalar_prefetch = 0 : i64, scratch_operands = 0 : i64, tpu.core_type = #tpu.core_type<tc>, window_params = [{transform_indices = @transform_0, window_bounds = array<i64: 1, 8, 256>}, {pipeline_mode = #tpu.pipeline_mode<synchronous>, transform_indices = @transform_1, window_bounds = array<i64: 8, 1>}, {pipeline_mode = #tpu.pipeline_mode<synchronous>, transform_indices = @transform_2, window_bounds = array<i64: 8, 1>}, {transform_indices = @transform_3, window_bounds = array<i64: 1, 8, 256>}]} {
    %c0 = arith.constant 0 : index
    %c0_0 = arith.constant 0 : index
    %c0_1 = arith.constant 0 : index
    %0 = vector.load %arg1[%c0, %c0_0, %c0_1] : memref<1x8x256xf32, #tpu.memory_space<vmem>>, vector<1x8x256xf32>
    %c0_2 = arith.constant 0 : index
    %c0_3 = arith.constant 0 : index
    %1 = vector.load %arg2[%c0_2, %c0_3] : memref<8x1xf32, #tpu.memory_space<vmem>>, vector<8x1xf32>
    %2 = vector.shape_cast %1 : vector<8x1xf32> to vector<1x8x1xf32>
    %3 = vector.broadcast %2 : vector<1x8x1xf32> to vector<1x8x256xf32>
    %4 = arith.mulf %0, %3 : vector<1x8x256xf32>
    %c0_4 = arith.constant 0 : index
    %c0_5 = arith.constant 0 : index
    %5 = vector.load %arg3[%c0_4, %c0_5] : memref<8x1xf32, #tpu.memory_space<vmem>>, vector<8x1xf32>
    %6 = vector.shape_cast %5 : vector<8x1xf32> to vector<1x8x1xf32>
    %7 = vector.broadcast %6 : vector<1x8x1xf32> to vector<1x8x256xf32>
    %8 = arith.addf %4, %7 : vector<1x8x256xf32>
    %c0_6 = arith.constant 0 : index
    %c0_7 = arith.constant 0 : index
    %c0_8 = arith.constant 0 : index
    %9 = vector.load %arg4[%c0_6, %c0_7, %c0_8] : memref<1x8x256xf32, #tpu.memory_space<vmem>>, vector<1x8x256xf32>
    tpu.vector_store %arg4[%c0_6, %c0_7, %c0_8], %8 {strides = array<i32>} : memref<1x8x256xf32, #tpu.memory_space<vmem>>, vector<1x8x256xf32>,
    return
  }
  func.func @transform_0(%arg0: i32) -> (i32, i32, i32) {
    %c0_i32 = arith.constant 0 : i32
    %c0_i32_0 = arith.constant 0 : i32
    %c0_i32_1 = arith.constant 0 : i32
    return %arg0, %c0_i32, %c0_i32_0 : i32, i32, i32
  }
  func.func @transform_1(%arg0: i32) -> (i32, i32) {
    %c0_i32 = arith.constant 0 : i32
    %c0_i32_0 = arith.constant 0 : i32
    %c0_i32_1 = arith.constant 0 : i32
    return %c0_i32, %c0_i32_0 : i32, i32
  }
  func.func @transform_2(%arg0: i32) -> (i32, i32) {
    %c0_i32 = arith.constant 0 : i32
    %c0_i32_0 = arith.constant 0 : i32
    %c0_i32_1 = arith.constant 0 : i32
    return %c0_i32, %c0_i32_0 : i32, i32
  }
  func.func @transform_3(%arg0: i32) -> (i32, i32, i32) {
    %c0_i32 = arith.constant 0 : i32
    %c0_i32_0 = arith.constant 0 : i32
    %c0_i32_1 = arith.constant 0 : i32
    return %arg0, %c0_i32, %c0_i32_0 : i32, i32, i32
  }
}

</mosaic_0001>

<bundles_post_ra>
// kernel: conv_block_forward.3
= control target key start
LH: loop header
LB: loop body
LE: loop exit
PB: predicated region body
PF: predicated region fallthrough
CT: control target
= control target key end

     0   :  { %s298_s12 = smov 0   ;;  %s321_s0 = inlined_call_operand.vmem [shape: f32[2,8,256], index: 0, kind: input, shape index: {}, may-alias: {0,3}]   ;;  %s322_s1 = inlined_call_operand.vmem [shape: f32[8,1], index: 1, kind: input, shape index: {}]   ;;  %s323_s2 = inlined_call_operand.vmem [shape: f32[8,1], index: 2, kind: input, shape index: {}]   ;;  %s324_s3 = inlined_call_operand.vmem [shape: f32[2,8,256], index: 3, kind: output, shape index: {}, may-alias: {0,3}]  }
   0x1 LB: > { %s246_s13 = sadd.s32 4294967295, %s275_s12   ;;  %p250_p0 = scmp.ge.s32.totalorder %s275_s12, 1  ;;  %s275_s12 = sphi %s298_s12, %s13_s12  }
   0x2   : > { %p137_p1 = scmp.lt.s32.totalorder %s275_s12, 3 }
   0x4   : > { %p138_p2 = pnand %p250_p0, %p137_p1 }
   0x5   : > { %p161_p3 = scmp.lt.s32.totalorder (!%p138_p2), %s246_s13, 1 }
   0x6   : > { %141 = sbr.rel (%p138_p2) target bundleno = 140 (0x8c), region = 32 }
   0xb   : > { %v173_v0 = vld [vmem:[%s322_s1] sm:$0xff]  ;;  %v277_v1 = vmov 0   ;;  %s326_s13 = smov (!%p161_p3, %s246_s13), 1 }
   0xc   : > { %268 = vset.pattern.permute.xlu0 %v277_v1  ;;  %v181_v2 = vld [vmem:[%s323_s2] sm:$0xff]  ;;  %s257_s18 = sshll.u32 %s326_s13, 4 }
   0xd   : > { %176 = vperm.xlu0 %268, %v173_v0   ;;  %s165_s21 = scalar_lea.vmem %s321_s0, %s257_s18  ;;  %s170_s24 = scalar_lea.vmem %s324_s3, %s257_s18 }
   0xe   : > { %v171_v4 = vld [vmem:[%s165_s21] sm:$0xff]  ;;  %v172_v5 = vld [vmem:[%s165_s21 + $0x8] sm:$0xff] }
  0x15   : > { %184 = vperm.xlu0 %268, %v181_v2  }
  0x7f   : > { %v177_v3 = vpop.permute.xlu0 %176 }
  0x80   : > { %v179_v6 = vmul.f32 %v177_v3, %v171_v4  ;;  %v180_v7 = vmul.f32 %v177_v3, %v172_v5 }
  0x87   : > { %v185_v8 = vpop.permute.xlu0 %184 }
  0x88   : > { %v187_v9 = vadd.f32 %v185_v8, %v179_v6  ;;  %v188_v10 = vadd.f32 %v185_v8, %v180_v7 }
  0x8a   : > { %189 = vst [vmem:[%s170_s24] sm:$0xff] %v187_v9 }
  0x8b   : > { %190 = vst [vmem:[%s170_s24 + $0x8] sm:$0xff] %v188_v10 }
  0x8c PF: > { %s13_s12 = sadd.s32 1, %s275_s12  }
  0x8d   : > { %p10_p4 = scmp.ge.s32.totalorder %s13_s12, 4  }
  0x8f   :  { %12 = sbr.rel (!%p10_p4) target bundleno = 1 (0x1), region = 62 }

// kernel: conv_block_forward.2
= control target key start
LH: loop header
LB: loop body
LE: loop exit
PB: predicated region body
PF: predicated region fallthrough
CT: control target
= control target key end

     0   :  { %s2067_s12 = smov 0   ;;  %s3431_s0 = inlined_call_operand.vmem [shape: f32[2,18,18,4], index: 0, kind: input, shape index: {}]   ;;  %s3432_s1 = inlined_call_operand.vmem [shape: f32[36,8], index: 1, kind: input, shape index: {}]   ;;  %s3433_s2 = inlined_call_operand.vmem [shape: f32[2,8,256], index: 2, kind: output, shape index: {0}]   ;;  %s3434_s3 = inlined_call_operand.vmem [shape: f32[2,8,2], index: 3, kind: output, shape index: {1}]  }
   0x1 LB: > { %s1954_s13 = sadd.s32 4294967295, %s2037_s12   ;;  %p1958_p0 = scmp.ge.s32.totalorder %s2037_s12, 1  ;;  %s2037_s12 = sphi %s2067_s12, %s14_s12  }
   0x2   : > { %p140_p1 = scmp.lt.s32.totalorder %s2037_s12, 3 }
   0x4   : > { %p141_p2 = pnand %p1958_p0, %p140_p1 }
   0x6   : > { %144 = sbr.rel (%p141_p2) target bundleno = 1148 (0x47c), region = 28 }
   0xb   : > { %p168_p3 = scmp.lt.s32.totalorder %s1954_s13, 1  ;;  %vm322_vm0 = vcmask 1046528   ;;  %s2039_s18 = smov 4   ;;  %vm532_vm1 = vcmask 1045504   ;;  %vm241_vm2 = vcmask 31744   ;;  %vm499_vm3 = vcmask 64544  }
   0xc   : > { %s2040_s19 = smov 8   ;;  %s2041_s20 = smov 12   ;;  %vm709_vm4 = vcmask 97344   ;;  %vm840_vm5 = vcmask 130144   ;;  %vm975_vm6 = vcmask 162944   ;;  %vm1109_vm7 = vcmask 195744  }
   0xd   : > { %s3623_s13 = smov (!%p168_p3, %s1954_s13), 1  ;;  %s2042_s21 = smov 16   ;;  %vm1240_vm8 = vcmask 228544   ;;  %vm1375_vm9 = vcmask 261344   ;;  %vm1671_vm10 = vcmask 1043456   ;;  %vm1509_vm11 = vcmask 294144  }
   0xe   : > { %s2014_s14 = smul.u32 432, %s3623_s13  ;;  %s2043_s22 = smov 20   ;;  %vm1574_vm12 = vcmask 293888   ;;  %vm1864_vm13 = vcmask 7168   ;;  %vm1866_vm14 = vcmask 15368  }
   0xf   : > { %s2044_s23 = smov 24   ;;  %s2045_s24 = smov 28  }
  0x10   : > { %s2081_s17 = scalar_lea.vmem %s3431_s0, %s2014_s14  ;;  %s2046_s25 = smov 32  }
  0x11   : > { %v2084_v0 = vld [vmem:[%s2081_s17 + $0x18] sm:$0xff]  ;;  %v2087_v1 = vld [vmem:[%s2081_s17 + $0x20] sm:$0xff]  ;;  %v2095_v5 = vld [vmem:[%s2081_s17 + $0x8] sm:$0xff]  ;;  %s1998_s9 = sshll.u32 %s3623_s13, 4  ;;  %s1962_s15 = sshll.u32 %s3623_s13, 3 }
  0x12   : > { %v2090_v2 = vld [vmem:[%s2081_s17] sm:$0xff]  ;;  %v328_v3 = vrot.slane %v2084_v0, 1  ;;  %v329_v4 = vrot.slane %v2087_v1, 1  ;;  %v324_v7 = vrot.slane %v2095_v5, 1  ;;  %v2100_v8 = vld [vmem:[%s2081_s17 + $0x28] sm:$0x3]  ;;  %s177_s14 = scalar_lea.vmem %s3433_s2, %s1998_s9 }
  0x13   : > { %v323_v6 = vrot.slane %v2090_v2, 1  ;;  %v2106_v10 = vld [vmem:[%s2081_s17 + $0x10] sm:$0x3]  ;;  %v331_v12 = vrot.slane %v2100_v8, 1  ;;  %v2117_v14 = vld [vmem:[%s2081_s17 + $0x38] sm:$0xff]  ;;  %v2142_v25 = vld [vmem:[%s2081_s17 + $0x48] sm:$0xff] }
  0x14   : > { %v2103_v9 = vsel %vm322_vm0, %v328_v3, %v329_v4  ;;  %v2114_v13 = vld [vmem:[%s2081_s17 + $0x30] sm:$0xff]  ;;  %v326_v15 = vrot.slane %v2106_v10, 1  ;;  %v334_v17 = vrot.slane %v2117_v14, 1  ;;  %v2123_v18 = vld [vmem:[%s2081_s17 + $0x40] sm:$0x3]  ;;  %v338_v28 = vrot.slane %v2142_v25, 1 }
  0x15   : > { %407 = vrot.lane.b32.xlu1 %v2103_v9, %s2039_s18  ;;  %v325_v11 = vsel %vm322_vm0, %v323_v6, %v324_v7  ;;  %v333_v16 = vrot.slane %v2114_v13, 1  ;;  %v2129_v20 = vsel %vm322_vm0, %v329_v4, %v331_v12  ;;  %v2135_v22 = vld [vmem:[%s2081_s17 + $0x50] sm:$0xff]  ;;  %v2138_v23 = vld [vmem:[%s2081_s17 + $0x58] sm:$0x3]  ;;  %v336_v24 = vrot.slane %v2123_v18, 1  ;;  %v2154_v30 = vld [vmem:[%s2081_s17 + $0x60] sm:$0xff] }
  0x16   : > { %403 = vrot.lane.b32.xlu0 %v325_v11, %s2039_s18  ;;  %v327_v21 = vsel %vm322_vm0, %v324_v7, %v326_v15  ;;  %v339_v26 = vrot.slane %v2135_v22, 1  ;;  %v341_v27 = vrot.slane %v2138_v23, 1  ;;  %v2160_v32 = vld [vmem:[%s2081_s17 + $0x68] sm:$0xff]  ;;  %v2168_v34 = vld [vmem:[%s2081_s17 + $0x78] sm:$0xff]  ;;  %v2171_v35 = vld [vmem:[%s2081_s17 + $0x80] sm:$0xff]  ;;  %v343_v36 = vrot.slane %v2154_v30, 1 }
  0x17   : > { %v2126_v19 = vsel %vm322_vm0, %v333_v16, %v334_v17  ;;  %v2151_v29 = vsel %vm322_vm0, %v334_v17, %v336_v24  ;;  %v2175_v37 = vld [vmem:[%s2081_s17 + $0x70] sm:$0x3]  ;;  %v344_v38 = vrot.slane %v2160_v32, 1  ;;  %v348_v39 = vrot.slane %v2168_v34, 1  ;;  %v2189_v43 = vld [vmem:[%s2081_s17 + $0x88] sm:$0x3] }
  0x18   : > { %411 = vrot.lane.b32.xlu2 %v2126_v19, %s2039_s18  ;;  %v2157_v31 = vsel %vm322_vm0, %v339_v26, %v341_v27  ;;  %v2165_v33 = vsel %vm322_vm0, %v338_v28, %v339_v26  ;;  %v349_v40 = vrot.slane %v2171_v35, 1  ;;  %v346_v41 = vrot.slane %v2175_v37, 1  ;;  %v2200_v46 = vld [vmem:[%s2081_s17 + $0x98] sm:$0xff]  ;;  %v2203_v47 = vld [vmem:[%s2081_s17 + $0xa0] sm:$0x3]  ;;  %v2207_v49 = vld [vmem:[%s2081_s17 + $0x90] sm:$0xff] }
  0x19   : > { %v2186_v42 = vsel %vm322_vm0, %v343_v36, %v344_v38  ;;  %v351_v48 = vrot.slane %v2189_v43, 1  ;;  %v354_v50 = vrot.slane %v2200_v46, 1  ;;  %v356_v51 = vrot.slane %v2203_v47, 1  ;;  %v2220_v54 = vld [vmem:[%s2081_s17 + $0xa8] sm:$0xff]  ;;  %v2226_v56 = vld [vmem:[%s2081_s17 + $0xb0] sm:$0xff]  ;;  %v2234_v58 = vld [vmem:[%s2081_s17 + $0xc0] sm:$0xff] }
  0x1a   : > { %3512 = vst [vmem:[#allocation3_spill] sm:$0xff] %v2186_v42  ;;  %v2192_v44 = vsel %vm322_vm0, %v348_v39, %v349_v40  ;;  %v2197_v45 = vsel %vm322_vm0, %v344_v38, %v346_v41  ;;  %v353_v52 = vrot.slane %v2207_v49, 1  ;;  %v2237_v59 = vld [vmem:[%s2081_s17 + $0xc8] sm:$0xff]  ;;  %v358_v60 = vrot.slane %v2220_v54, 1  ;;  %v2241_v61 = vld [vmem:[%s2081_s17 + $0xb8] sm:$0x3] }
  0x1b   : > { %3513 = vst [vmem:[#allocation4_spill] sm:$0xff] %v2192_v44  ;;  %v2217_v53 = vsel %vm322_vm0, %v349_v40, %v351_v48  ;;  %v2223_v55 = vsel %vm322_vm0, %v354_v50, %v356_v51  ;;  %v359_v62 = vrot.slane %v2226_v56, 1  ;;  %v363_v63 = vrot.slane %v2234_v58, 1  ;;  %v2255_v7 = vld [vmem:[%s2081_s17 + $0xd0] sm:$0x3]  ;;  %v2266_v15 = vld [vmem:[%s2081_s17 + $0xe0] sm:$0xff] }
  0x1c   : > { %3514 = vst [vmem:[#allocation5_spill] sm:$0xff] %v2197_v45  ;;  %v2231_v57 = vsel %vm322_vm0, %v353_v52, %v354_v50  ;;  %v364_v3 = vrot.slane %v2237_v59, 1  ;;  %v361_v4 = vrot.slane %v2241_v61, 1  ;;  %v2269_v16 = vld [vmem:[%s2081_s17 + $0xe8] sm:$0x3]  ;;  %v366_v17 = vrot.slane %v2255_v7, 1 }
  0x1d   : > { %409 = vrot.lane.b32.xlu1 %v2129_v20, %s2039_s18  ;;  %3515 = vst [vmem:[#allocation6_spill] sm:$0xff] %v2217_v53  ;;  %v2252_v6 = vsel %vm322_vm0, %v358_v60, %v359_v62  ;;  %v369_v24 = vrot.slane %v2266_v15, 1  ;;  %v371_v26 = vrot.slane %v2269_v16, 1  ;;  %v2286_v36 = vld [vmem:[%s2081_s17 + $0xf0] sm:$0xff]  ;;  %v2292_v39 = vld [vmem:[%s2081_s17 + $0xf8] sm:$0xff]  ;;  %v2300_v41 = vld [vmem:[%s2081_s17 + $0x108] sm:$0xff] }
  0x1e   : > { %405 = vrot.lane.b32.xlu0 %v327_v21, %s2039_s18  ;;  %3516 = vst [vmem:[#allocation7_spill] sm:$0xff] %v2223_v55  ;;  %v2258_v11 = vsel %vm322_vm0, %v363_v63, %v364_v3  ;;  %v2263_v12 = vsel %vm322_vm0, %v359_v62, %v361_v4  ;;  %v2273_v21 = vld [vmem:[%s2081_s17 + $0xd8] sm:$0xff]  ;;  %v2283_v28 = vsel %vm322_vm0, %v364_v3, %v366_v17  ;;  %v2303_v48 = vld [vmem:[%s2081_s17 + $0x110] sm:$0xff]  ;;  %v373_v50 = vrot.slane %v2286_v36, 1  ;;  %v2307_v51 = vld [vmem:[%s2081_s17 + $0x100] sm:$0x3] }
  0x1f   : > { %3517 = vst [vmem:[#allocation8_spill] sm:$0xff] %v2231_v57  ;;  %v368_v27 = vrot.slane %v2273_v21, 1  ;;  %v2289_v38 = vsel %vm322_vm0, %v369_v24, %v371_v26  ;;  %v374_v52 = vrot.slane %v2292_v39, 1  ;;  %v378_v60 = vrot.slane %v2300_v41, 1  ;;  %v2321_v4 = vld [vmem:[%s2081_s17 + $0x118] sm:$0x3] }
  0x20   : > { %413 = vrot.lane.b32.xlu2 %v2151_v29, %s2039_s18  ;;  %3518 = vst [vmem:[#allocation9_spill] sm:$0xff] %v2252_v6  ;;  %v379_v62 = vrot.slane %v2303_v48, 1  ;;  %v376_v63 = vrot.slane %v2307_v51, 1  ;;  %v2332_v26 = vld [vmem:[%s2081_s17 + $0x128] sm:$0xff] }
  0x21   : > { %3519 = vst [vmem:[#allocation10_spill] sm:$0xff] %v2258_v11  ;;  %v2297_v40 = vsel %vm322_vm0, %v368_v27, %v369_v24  ;;  %v2318_v3 = vsel %vm322_vm0, %v373_v50, %v374_v52  ;;  %v2335_v27 = vld [vmem:[%s2081_s17 + $0x130] sm:$0x3]  ;;  %v381_v50 = vrot.slane %v2321_v4, 1 }
  0x22   : > { %3520 = vst [vmem:[#allocation11_spill] sm:$0xff] %v2263_v12  ;;  %v2324_v17 = vsel %vm322_vm0, %v378_v60, %v379_v62  ;;  %v2329_v24 = vsel %vm322_vm0, %v374_v52, %v376_v63  ;;  %v384_v52 = vrot.slane %v2332_v26, 1  ;;  %v386_v60 = vrot.slane %v2335_v27, 1 }
  0x23   : > { %3521 = vst [vmem:[#allocation12_spill] sm:$0xff] %v2283_v28 }
  0x24   : > { %3522 = vst [vmem:[#allocation13_spill] sm:$0xff] %v2289_v38 }
  0x25   : > { %417 = vrot.lane.b32.xlu1 %v2157_v31, %s2039_s18  ;;  %3523 = vst [vmem:[#allocation14_spill] sm:$0xff] %v2297_v40 }
  0x26   : > { %415 = vrot.lane.b32.xlu0 %v2165_v33, %s2039_s18  ;;  %3524 = vst [vmem:[#allocation15_spill] sm:$0xff] %v2318_v3 }
  0x27   : > { %3525 = vst [vmem:[#allocation16_spill] sm:$0xff] %v2324_v17 }
  0x28   : > { %419 = vrot.lane.b32.xlu2 %v2186_v42, %s2039_s18  ;;  %3526 = vst [vmem:[#allocation17_spill] sm:$0xff] %v2329_v24  ;;  %v2405_v42 = vld [vmem:[%s2081_s17 + $0x168] sm:$0xff] }
  0x29   : > { %244 = vst.msk [vmem:[#allocation2 + $0x10] sm:$0xff] %vm241_vm2, %v2084_v0 }
  0x2a   : > { %242 = vst.msk [vmem:[#allocation2] sm:$0xff] %vm241_vm2, %v2090_v2 }
  0x2b   : > { %243 = vst.msk [vmem:[#allocation2 + $0x8] sm:$0xff] %vm241_vm2, %v2095_v5 }
  0x2c   : > { %245 = vst.msk [vmem:[#allocation2 + $0x18] sm:$0xff] %vm241_vm2, %v2087_v1 }
  0x2d   : > { %423 = vrot.lane.b32.xlu1 %v2192_v44, %s2039_s18  ;;  %246 = vst.msk [vmem:[#allocation2 + $0x20] sm:$0xff] %vm241_vm2, %v2114_v13 }
  0x2e   : > { %421 = vrot.lane.b32.xlu0 %v2197_v45, %s2039_s18  ;;  %v534_v45 = vrot.slane %v2095_v5, 2  ;;  %247 = vst.msk [vmem:[#allocation2 + $0x28] sm:$0xff] %vm241_vm2, %v2117_v14  ;;  %v546_v5 = vrot.slane %v2123_v18, 2 }
  0x2f   : > { %248 = vst.msk [vmem:[#allocation2 + $0x30] sm:$0xff] %vm241_vm2, %v2142_v25 }
  0x30   : > { %425 = vrot.lane.b32.xlu2 %v2217_v53, %s2039_s18  ;;  %249 = vst.msk [vmem:[#allocation2 + $0x38] sm:$0xff] %vm241_vm2, %v2135_v22 }
  0x31   : > { %250 = vst.msk [vmem:[#allocation2 + $0x40] sm:$0xff] %vm241_vm2, %v2154_v30 }
  0x32   : > { %251 = vst.msk [vmem:[#allocation2 + $0x48] sm:$0xff] %vm241_vm2, %v2160_v32 }
  0x33   : > { %252 = vst.msk [vmem:[#allocation2 + $0x50] sm:$0xff] %vm241_vm2, %v2168_v34 }
  0x34   : > { %253 = vst.msk [vmem:[#allocation2 + $0x58] sm:$0xff] %vm241_vm2, %v2171_v35 }
  0x35   : > { %429 = vrot.lane.b32.xlu1 %v2223_v55, %s2039_s18  ;;  %v2387_v55 = vld [vmem:[%s2081_s17 + $0x160] sm:$0x3]  ;;  %254 = vst.msk [vmem:[#allocation2 + $0x60] sm:$0xff] %vm241_vm2, %v2207_v49 }
  0x36   : > { %427 = vrot.lane.b32.xlu0 %v2231_v57, %s2039_s18  ;;  %v2401_v57 = vld [vmem:[%s2081_s17 + $0x178] sm:$0x3]  ;;  %v396_v44 = vrot.slane %v2387_v55, 1  ;;  %255 = vst.msk [vmem:[#allocation2 + $0x68] sm:$0xff] %vm241_vm2, %v2200_v46 }
  0x37   : > { %256 = vst.msk [vmem:[#allocation2 + $0x70] sm:$0xff] %vm241_vm2, %v2220_v54 }
  0x38   : > { %431 = vrot.lane.b32.xlu2 %v2252_v6, %s2039_s18  ;;  %v2373_v6 = vld [vmem:[%s2081_s17 + $0x148] sm:$0x3]  ;;  %257 = vst.msk [vmem:[#allocation2 + $0x78] sm:$0xff] %vm241_vm2, %v2226_v56 }
  0x39   : > { %258 = vst.msk [vmem:[#allocation2 + $0x80] sm:$0xff] %vm241_vm2, %v2234_v58 }
  0x3a   : > { %259 = vst.msk [vmem:[#allocation2 + $0x88] sm:$0xff] %vm241_vm2, %v2237_v59 }
  0x3b   : > { %260 = vst.msk [vmem:[#allocation2 + $0x90] sm:$0xff] %vm241_vm2, %v2273_v21 }
  0x3c   : > { %261 = vst.msk [vmem:[#allocation2 + $0x98] sm:$0xff] %vm241_vm2, %v2266_v15 }
  0x3d   : > { %435 = vrot.lane.b32.xlu1 %v2258_v11, %s2039_s18  ;;  %v2358_v11 = vld [vmem:[%s2081_s17 + $0x140] sm:$0xff]  ;;  %262 = vst.msk [vmem:[#allocation2 + $0xa0] sm:$0xff] %vm241_vm2, %v2286_v36 }
  0x3e   : > { %433 = vrot.lane.b32.xlu0 %v2263_v12, %s2039_s18  ;;  %263 = vst.msk [vmem:[#allocation2 + $0xa8] sm:$0xff] %vm241_vm2, %v2292_v39 }
  0x3f   : > { %264 = vst.msk [vmem:[#allocation2 + $0xb0] sm:$0xff] %vm241_vm2, %v2300_v41 }
  0x40   : > { %437 = vrot.lane.b32.xlu2 %v2283_v28, %s2039_s18  ;;  %v2352_v28 = vld [vmem:[%s2081_s17 + $0x138] sm:$0xff]  ;;  %265 = vst.msk [vmem:[#allocation2 + $0xb8] sm:$0xff] %vm241_vm2, %v2303_v48 }
  0x41   : > { %267 = vst.msk [vmem:[#allocation2 + $0xc8] sm:$0xff] %vm241_vm2, %v2332_v26 }
  0x42   : > { %268 = vst.msk [vmem:[#allocation2 + $0xd0] sm:$0xff] %vm241_vm2, %v2352_v28 }
  0x43   : > { %269 = vst.msk [vmem:[#allocation2 + $0xd8] sm:$0xff] %vm241_vm2, %v2358_v11 }
  0x44   : > { %272 = vst.msk [vmem:[#allocation2 + $0xf0] sm:$0xff] %vm241_vm2, %v2405_v42 }
  0x45   : > { %441 = vrot.lane.b32.xlu1 %v2289_v38, %s2039_s18  ;;  %v2339_v38 = vld [vmem:[%s2081_s17 + $0x120] sm:$0xff] }
  0x46   : > { %439 = vrot.lane.b32.xlu0 %v2297_v40, %s2039_s18  ;;  %v383_v63 = vrot.slane %v2339_v38, 1  ;;  %v2355_v40 = vsel %vm322_vm0, %v384_v52, %v386_v60  ;;  %v389_v60 = vrot.slane %v2358_v11, 1  ;;  %266 = vst.msk [vmem:[#allocation2 + $0xc0] sm:$0xff] %vm241_vm2, %v2339_v38 }
  0x47   : > { %3528 = vst [vmem:[#allocation19_spill] sm:$0xff] %v2355_v40 }
  0x48   : > { %443 = vrot.lane.b32.xlu2 %v2318_v3, %s2039_s18  ;;  %v2349_v3 = vsel %vm322_vm0, %v379_v62, %v381_v50  ;;  %v2369_v62 = vld [vmem:[%s2081_s17 + $0x158] sm:$0xff]  ;;  %v388_v50 = vrot.slane %v2352_v28, 1 }
  0x49   : > { %3527 = vst [vmem:[#allocation18_spill] sm:$0xff] %v2349_v3 }
  0x4a   : > { %v2384_v12 = vsel %vm322_vm0, %v388_v50, %v389_v60  ;;  %271 = vst.msk [vmem:[#allocation2 + $0xe8] sm:$0xff] %vm241_vm2, %v2369_v62 }
  0x4b   : > { %3530 = vst [vmem:[#allocation21_spill] sm:$0xff] %v2384_v12 }
  0x4d   : > { %447 = vrot.lane.b32.xlu1 %v2324_v17, %s2039_s18  ;;  %v2363_v17 = vsel %vm322_vm0, %v383_v63, %v384_v52  ;;  %v394_v63 = vrot.slane %v2369_v62, 1 }
  0x4e   : > { %445 = vrot.lane.b32.xlu0 %v2329_v24, %s2039_s18  ;;  %3529 = vst [vmem:[#allocation20_spill] sm:$0xff] %v2363_v17  ;;  %v2366_v24 = vld [vmem:[%s2081_s17 + $0x150] sm:$0xff] }
  0x4f   : > { %v393_v52 = vrot.slane %v2366_v24, 1  ;;  %270 = vst.msk [vmem:[#allocation2 + $0xe0] sm:$0xff] %vm241_vm2, %v2366_v24 }
  0x50   : > { %449 = vrot.lane.b32.xlu2 %v2349_v3, %s2039_s18  ;;  %v391_v3 = vrot.slane %v2373_v6, 1 }
  0x51   : > { %v2390_v53 = vsel %vm322_vm0, %v393_v52, %v394_v63  ;;  %v401_v52 = vrot.slane %v2401_v57, 1 }
  0x52   : > { %3531 = vst [vmem:[#allocation22_spill] sm:$0xff] %v2390_v53 }
  0x55   : > { %453 = vrot.lane.b32.xlu1 %v2355_v40, %s2039_s18  ;;  %v2395_v40 = vsel %vm322_vm0, %v389_v60, %v391_v3  ;;  %v398_v3 = vrot.slane %v2405_v42, 1  ;;  %v2415_v60 = vsel %vm322_vm0, %v394_v63, %v396_v44  ;;  %v538_v44 = vrot.slane %v2084_v0, 2 }
  0x56   : > { %451 = vrot.lane.b32.xlu0 %v2363_v17, %s2039_s18  ;;  %3532 = vst [vmem:[#allocation23_spill] sm:$0xff] %v2395_v40  ;;  %v2398_v17 = vld [vmem:[%s2081_s17 + $0x170] sm:$0xff]  ;;  %v539_v63 = vrot.slane %v2087_v1, 2 }
  0x57   : > { %v399_v50 = vrot.slane %v2398_v17, 1  ;;  %273 = vst.msk [vmem:[#allocation2 + $0xf8] sm:$0xff] %vm241_vm2, %v2398_v17 }
  0x58   : > { %455 = vrot.lane.b32.xlu2 %v2384_v12, %s2039_s18 }
  0x59   : > { %v2418_v12 = vsel %vm322_vm0, %v399_v50, %v401_v52  ;;  %v536_v52 = vrot.slane %v2106_v10, 2 }
  0x5a   : > { %3533 = vst [vmem:[#allocation24_spill] sm:$0xff] %v2418_v12 }
  0x5b   : > { %v537_v10 = vsel %vm532_vm1, %v534_v45, %v536_v52 }
  0x5d   : > { %459 = vrot.lane.b32.xlu1 %v2390_v53, %s2039_s18  ;;  %v2423_v53 = vsel %vm322_vm0, %v398_v3, %v399_v50  ;;  %v2442_v3 = vsel %vm532_vm1, %v538_v44, %v539_v63 }
  0x5e   : > { %457 = vrot.lane.b32.xlu0 %v2395_v40, %s2039_s18  ;;  %3534 = vst [vmem:[#allocation25_spill] sm:$0xff] %v2423_v53  ;;  %v533_v40 = vrot.slane %v2090_v2, 2  ;;  %v544_v2 = vrot.slane %v2117_v14, 2 }
  0x60   : > { %461 = vrot.lane.b32.xlu2 %v2415_v60, %s2039_s18  ;;  %v535_v50 = vsel %vm532_vm1, %v533_v40, %v534_v45  ;;  %v541_v40 = vrot.slane %v2100_v8, 2  ;;  %v543_v8 = vrot.slane %v2114_v13, 2  ;;  %v2473_v44 = vsel %vm532_vm1, %v544_v2, %v546_v5 }
  0x61   : > { %3535 = vst [vmem:[#allocation26_spill] sm:$0xff] %v2473_v44 }
  0x62   : > { %v2464_v45 = vsel %vm532_vm1, %v539_v63, %v541_v40  ;;  %v2480_v18 = vsel %vm532_vm1, %v543_v8, %v544_v2  ;;  %v548_v63 = vrot.slane %v2142_v25, 2  ;;  %v554_v40 = vrot.slane %v2160_v32, 2 }
  0x63   : > { %v551_v2 = vrot.slane %v2138_v23, 2 }
  0x65   : > { %465 = vrot.lane.b32.xlu1 %v2418_v12, %s2039_s18 }
  0x66   : > { %463 = vrot.lane.b32.xlu0 %v2423_v53, %s2039_s18  ;;  %s181_s18 = scalar_lea.vmem %s3434_s3, %s1962_s15 }
  0x68   : > { %613 = vrot.lane.b32.xlu2 %v535_v50, %s2040_s19  ;;  %v549_v50 = vrot.slane %v2135_v22, 2 }
  0x6a   : > { %v2502_v5 = vsel %vm532_vm1, %v548_v63, %v549_v50  ;;  %v2516_v23 = vsel %vm532_vm1, %v549_v50, %v551_v2  ;;  %v556_v63 = vrot.slane %v2175_v37, 2  ;;  %v559_v50 = vrot.slane %v2171_v35, 2 }
  0x6b   : > { %3536 = vst [vmem:[#allocation27_spill] sm:$0xff] %v2502_v5  ;;  %v558_v37 = vrot.slane %v2168_v34, 2 }
  0x6c   : > { %3538 = vst [vmem:[#allocation29_spill] sm:$0xff] %v2516_v23  ;;  %v2537_v2 = vsel %vm532_vm1, %v554_v40, %v556_v63 }
  0x6d   : > { %617 = vrot.lane.b32.xlu1 %v2442_v3, %s2040_s19  ;;  %3539 = vst [vmem:[#allocation30_spill] sm:$0xff] %v2537_v2 }
  0x6e   : > { %615 = vrot.lane.b32.xlu0 %v537_v10, %s2040_s19  ;;  %v553_v10 = vrot.slane %v2154_v30, 2 }
  0x70   : > { %619 = vrot.lane.b32.xlu2 %v2464_v45, %s2040_s19  ;;  %v2509_v8 = vsel %vm532_vm1, %v553_v10, %v554_v40  ;;  %v561_v10 = vrot.slane %v2189_v43, 2  ;;  %v2551_v43 = vsel %vm532_vm1, %v558_v37, %v559_v50  ;;  %v563_v40 = vrot.slane %v2207_v49, 2 }
  0x71   : > { %3537 = vst [vmem:[#allocation28_spill] sm:$0xff] %v2509_v8  ;;  %v569_v37 = vrot.slane %v2226_v56, 2 }
  0x72   : > { %v412_v52 = vpop.permute.xlu2 %411  ;;  %3541 = vst [vmem:[#allocation32_spill] sm:$0xff] %v2551_v43 }
  0x73   : > { %504 = vst.msk [vmem:[#allocation2 + $0x20] sm:$0xff] %vm499_vm3, %v412_v52 }
  0x75   : > { %623 = vrot.lane.b32.xlu1 %v2473_v44, %s2040_s19 }
  0x76   : > { %621 = vrot.lane.b32.xlu0 %v2480_v18, %s2040_s19 }
  0x78   : > { %625 = vrot.lane.b32.xlu2 %v2502_v5, %s2040_s19 }
  0x7a   : > { %v414_v44 = vpop.permute.xlu2 %413 }
  0x7b   : > { %505 = vst.msk [vmem:[#allocation2 + $0x28] sm:$0xff] %vm499_vm3, %v414_v44  ;;  %v574_v44 = vrot.slane %v2237_v59, 2 }
  0x7d   : > { %629 = vrot.lane.b32.xlu1 %v2509_v8, %s2040_s19  ;;  %v2544_v8 = vsel %vm532_vm1, %v559_v50, %v561_v10  ;;  %v564_v10 = vrot.slane %v2200_v46, 2  ;;  %v568_v50 = vrot.slane %v2220_v54, 2 }
  0x7e   : > { %627 = vrot.lane.b32.xlu0 %v2516_v23, %s2040_s19  ;;  %3540 = vst [vmem:[#allocation31_spill] sm:$0xff] %v2544_v8 }
  0x7f   : > { %v2572_v5 = vsel %vm532_vm1, %v563_v40, %v564_v10 }
  0x80   : > { %631 = vrot.lane.b32.xlu2 %v2537_v2, %s2040_s19 }
  0x82   : > { %v420_v63 = vpop.permute.xlu2 %419 }
  0x83   : > { %508 = vst.msk [vmem:[#allocation2 + $0x40] sm:$0xff] %vm499_vm3, %v420_v63 }
  0x85   : > { %635 = vrot.lane.b32.xlu1 %v2544_v8, %s2040_s19  ;;  %v566_v8 = vrot.slane %v2203_v47, 2  ;;  %v571_v47 = vrot.slane %v2241_v61, 2 }
  0x86   : > { %633 = vrot.lane.b32.xlu0 %v2551_v43, %s2040_s19  ;;  %v2577_v43 = vsel %vm532_vm1, %v568_v50, %v569_v37 }
  0x87   : > { %v408_v2 = vpop.permute.xlu1 %407  ;;  %v2583_v52 = vsel %vm532_vm1, %v564_v10, %v566_v8  ;;  %v573_v8 = vrot.slane %v2234_v58, 2  ;;  %v2596_v63 = vsel %vm532_vm1, %v569_v37, %v571_v47  ;;  %v579_v37 = vrot.slane %v2266_v15, 2 }
  0x88   : > { %502 = vst.msk [vmem:[#allocation2 + $0x10] sm:$0xff] %vm499_vm3, %v408_v2  ;;  %v404_v23 = vpop.permute.xlu0 %403  ;;  %637 = vrot.lane.b32.xlu2 %v2572_v5, %s2040_s19  ;;  %v583_v47 = vrot.slane %v2286_v36, 2 }
  0x89   : > { %500 = vst.msk [vmem:[#allocation2] sm:$0xff] %vm499_vm3, %v404_v23  ;;  %v576_v23 = vrot.slane %v2255_v7, 2  ;;  %v2606_v50 = vsel %vm532_vm1, %v573_v8, %v574_v44  ;;  %v578_v7 = vrot.slane %v2273_v21, 2 }
  0x8a   : > { %v426_v40 = vpop.permute.xlu2 %425  ;;  %3542 = vst [vmem:[#allocation33_spill] sm:$0xff] %v2596_v63 }
  0x8b   : > { %511 = vst.msk [vmem:[#allocation2 + $0x58] sm:$0xff] %vm499_vm3, %v426_v40  ;;  %v2601_v10 = vsel %vm532_vm1, %v574_v44, %v576_v23  ;;  %v584_v23 = vrot.slane %v2292_v39, 2  ;;  %v581_v44 = vrot.slane %v2269_v16, 2  ;;  %v2619_v8 = vsel %vm532_vm1, %v578_v7, %v579_v37 }
  0x8c   : > { %3543 = vst [vmem:[#allocation34_spill] sm:$0xff] %v2601_v10  ;;  %v589_v7 = vrot.slane %v2303_v48, 2 }
  0x8d   : > { %641 = vrot.lane.b32.xlu1 %v2577_v43, %s2040_s19  ;;  %3544 = vst [vmem:[#allocation35_spill] sm:$0xff] %v2606_v50 }
  0x8e   : > { %639 = vrot.lane.b32.xlu0 %v2583_v52, %s2040_s19  ;;  %3545 = vst [vmem:[#allocation36_spill] sm:$0xff] %v2619_v8 }
  0x8f   : > { %v410_v2 = vpop.permute.xlu1 %409 }
  0x90   : > { %503 = vst.msk [vmem:[#allocation2 + $0x18] sm:$0xff] %vm499_vm3, %v410_v2  ;;  %v406_v61 = vpop.permute.xlu0 %405  ;;  %643 = vrot.lane.b32.xlu2 %v2596_v63, %s2040_s19  ;;  %v586_v63 = vrot.slane %v2307_v51, 2 }
  0x91   : > { %501 = vst.msk [vmem:[#allocation2 + $0x8] sm:$0xff] %vm499_vm3, %v406_v61 }
  0x92   : > { %v432_v40 = vpop.permute.xlu2 %431 }
  0x93   : > { %514 = vst.msk [vmem:[#allocation2 + $0x70] sm:$0xff] %vm499_vm3, %v432_v40  ;;  %v2624_v40 = vsel %vm532_vm1, %v583_v47, %v584_v23  ;;  %v591_v47 = vrot.slane %v2321_v4, 2  ;;  %v593_v4 = vrot.slane %v2339_v38, 2 }
  0x94   : > { %3546 = vst [vmem:[#allocation37_spill] sm:$0xff] %v2624_v40 }
  0x95   : > { %647 = vrot.lane.b32.xlu1 %v2601_v10, %s2040_s19  ;;  %v2629_v10 = vsel %vm532_vm1, %v579_v37, %v581_v44  ;;  %v2641_v37 = vsel %vm532_vm1, %v584_v23, %v586_v63  ;;  %v2646_v44 = vsel %vm532_vm1, %v589_v7, %v591_v47  ;;  %v594_v63 = vrot.slane %v2332_v26, 2 }
  0x96   : > { %645 = vrot.lane.b32.xlu0 %v2606_v50, %s2040_s19  ;;  %3547 = vst [vmem:[#allocation38_spill] sm:$0xff] %v2629_v10  ;;  %v598_v23 = vrot.slane %v2352_v28, 2  ;;  %v599_v47 = vrot.slane %v2358_v11, 2 }
  0x97   : > { %v418_v2 = vpop.permute.xlu1 %417  ;;  %3548 = vst [vmem:[#allocation39_spill] sm:$0xff] %v2641_v37 }
  0x98   : > { %507 = vst.msk [vmem:[#allocation2 + $0x38] sm:$0xff] %vm499_vm3, %v418_v2  ;;  %v416_v61 = vpop.permute.xlu0 %415  ;;  %649 = vrot.lane.b32.xlu2 %v2619_v8, %s2040_s19 }
  0x99   : > { %506 = vst.msk [vmem:[#allocation2 + $0x30] sm:$0xff] %vm499_vm3, %v416_v61  ;;  %v588_v61 = vrot.slane %v2300_v41, 2 }
  0x9a   : > { %v438_v16 = vpop.permute.xlu2 %437  ;;  %3549 = vst [vmem:[#allocation40_spill] sm:$0xff] %v2646_v44 }
  0x9b   : > { %517 = vst.msk [vmem:[#allocation2 + $0x88] sm:$0xff] %vm499_vm3, %v438_v16  ;;  %v2651_v16 = vsel %vm532_vm1, %v588_v61, %v589_v7  ;;  %v596_v7 = vrot.slane %v2335_v27, 2  ;;  %v2664_v61 = vsel %vm532_vm1, %v593_v4, %v594_v63  ;;  %v604_v4 = vrot.slane %v2369_v62, 2 }
  0x9d   : > { %653 = vrot.lane.b32.xlu1 %v2624_v40, %s2040_s19 }
  0x9e   : > { %651 = vrot.lane.b32.xlu0 %v2629_v10, %s2040_s19 }
  0x9f   : > { %v424_v2 = vpop.permute.xlu1 %423 }
  0xa0   : > { %510 = vst.msk [vmem:[#allocation2 + $0x50] sm:$0xff] %vm499_vm3, %v424_v2  ;;  %v422_v51 = vpop.permute.xlu0 %421  ;;  %655 = vrot.lane.b32.xlu2 %v2641_v37, %s2040_s19  ;;  %v601_v37 = vrot.slane %v2373_v6, 2 }
  0xa1   : > { %509 = vst.msk [vmem:[#allocation2 + $0x48] sm:$0xff] %vm499_vm3, %v422_v51 }
  0xa2   : > { %v444_v40 = vpop.permute.xlu2 %443 }
  0xa3   : > { %520 = vst.msk [vmem:[#allocation2 + $0xa0] sm:$0xff] %vm499_vm3, %v444_v40  ;;  %v2669_v40 = vsel %vm532_vm1, %v598_v23, %v599_v47  ;;  %v606_v23 = vrot.slane %v2387_v55, 2  ;;  %v608_v55 = vrot.slane %v2405_v42, 2 }
  0xa4   : > { %3550 = vst [vmem:[#allocation41_spill] sm:$0xff] %v2669_v40 }
  0xa5   : > { %659 = vrot.lane.b32.xlu1 %v2646_v44, %s2040_s19  ;;  %v2674_v44 = vsel %vm532_vm1, %v594_v63, %v596_v7  ;;  %v2686_v63 = vsel %vm532_vm1, %v599_v47, %v601_v37  ;;  %v2691_v7 = vsel %vm532_vm1, %v604_v4, %v606_v23  ;;  %v609_v37 = vrot.slane %v2398_v17, 2 }
  0xa6   : > { %657 = vrot.lane.b32.xlu0 %v2651_v16, %s2040_s19  ;;  %3551 = vst [vmem:[#allocation42_spill] sm:$0xff] %v2686_v63  ;;  %v611_v23 = vrot.slane %v2401_v57, 2 }
  0xa7   : > { %v430_v2 = vpop.permute.xlu1 %429 }
  0xa8   : > { %513 = vst.msk [vmem:[#allocation2 + $0x68] sm:$0xff] %vm499_vm3, %v430_v2  ;;  %v428_v51 = vpop.permute.xlu0 %427  ;;  %661 = vrot.lane.b32.xlu2 %v2664_v61, %s2040_s19 }
  0xa9   : > { %512 = vst.msk [vmem:[#allocation2 + $0x60] sm:$0xff] %vm499_vm3, %v428_v51  ;;  %v603_v51 = vrot.slane %v2366_v24, 2 }
  0xaa   : > { %v450_v27 = vpop.permute.xlu2 %449 }
  0xab   : > { %523 = vst.msk [vmem:[#allocation2 + $0xb8] sm:$0xff] %vm499_vm3, %v450_v27  ;;  %v2696_v27 = vsel %vm532_vm1, %v603_v51, %v604_v4  ;;  %v2714_v51 = vsel %vm532_vm1, %v609_v37, %v611_v23 }
  0xac   : > { %3552 = vst [vmem:[#allocation43_spill] sm:$0xff] %v2714_v51 }
  0xad   : > { %665 = vrot.lane.b32.xlu1 %v2669_v40, %s2040_s19 }
  0xae   : > { %663 = vrot.lane.b32.xlu0 %v2674_v44, %s2040_s19 }
  0xaf   : > { %v436_v2 = vpop.permute.xlu1 %435 }
  0xb0   : > { %516 = vst.msk [vmem:[#allocation2 + $0x80] sm:$0xff] %vm499_vm3, %v436_v2  ;;  %v434_v6 = vpop.permute.xlu0 %433  ;;  %667 = vrot.lane.b32.xlu2 %v2686_v63, %s2040_s19  ;;  %v2707_v2 = vsel %vm532_vm1, %v608_v55, %v609_v37 }
  0xb1   : > { %515 = vst.msk [vmem:[#allocation2 + $0x78] sm:$0xff] %vm499_vm3, %v434_v6 }
  0xb2   : > { %v456_v40 = vpop.permute.xlu2 %455 }
  0xb3   : > { %526 = vst.msk [vmem:[#allocation2 + $0xd0] sm:$0xff] %vm499_vm3, %v456_v40 }
  0xb5   : > { %671 = vrot.lane.b32.xlu1 %v2691_v7, %s2040_s19 }
  0xb6   : > { %669 = vrot.lane.b32.xlu0 %v2696_v27, %s2040_s19 }
  0xb7   : > { %v442_v47 = vpop.permute.xlu1 %441 }
  0xb8   : > { %519 = vst.msk [vmem:[#allocation2 + $0x98] sm:$0xff] %vm499_vm3, %v442_v47  ;;  %v440_v4 = vpop.permute.xlu0 %439  ;;  %673 = vrot.lane.b32.xlu2 %v2707_v2, %s2040_s19 }
  0xb9   : > { %518 = vst.msk [vmem:[#allocation2 + $0x90] sm:$0xff] %vm499_vm3, %v440_v4 }
  0xba   : > { %v462_v40 = vpop.permute.xlu2 %461 }
  0xbb   : > { %529 = vst.msk [vmem:[#allocation2 + $0xe8] sm:$0xff] %vm499_vm3, %v462_v40 }
  0xbd   : > { %744 = vrot.lane.b32.xlu1 %v2084_v0, %s2041_s20 }
  0xbe   : > { %675 = vrot.lane.b32.xlu0 %v2714_v51, %s2040_s19 }
  0xbf   : > { %v448_v57 = vpop.permute.xlu1 %447 }
  0xc0   : > { %522 = vst.msk [vmem:[#allocation2 + $0xb0] sm:$0xff] %vm499_vm3, %v448_v57  ;;  %v446_v6 = vpop.permute.xlu0 %445  ;;  %746 = vrot.lane.b32.xlu2 %v2087_v1, %s2041_s20 }
  0xc1   : > { %521 = vst.msk [vmem:[#allocation2 + $0xa8] sm:$0xff] %vm499_vm3, %v446_v6 }
  0xc2   : > { %v614_v55 = vpop.permute.xlu2 %613 }
  0xc3   : > { %710 = vst.msk [vmem:[#allocation2] sm:$0xff] %vm709_vm4, %v614_v55 }
  0xc5   : > { %750 = vrot.lane.b32.xlu1 %v2117_v14, %s2041_s20 }
  0xc6   : > { %748 = vrot.lane.b32.xlu0 %v2114_v13, %s2041_s20 }
  0xc7   : > { %v454_v0 = vpop.permute.xlu1 %453 }
  0xc8   : > { %525 = vst.msk [vmem:[#allocation2 + $0xc8] sm:$0xff] %vm499_vm3, %v454_v0  ;;  %v452_v37 = vpop.permute.xlu0 %451  ;;  %752 = vrot.lane.b32.xlu2 %v2142_v25, %s2041_s20 }
  0xc9   : > { %524 = vst.msk [vmem:[#allocation2 + $0xc0] sm:$0xff] %vm499_vm3, %v452_v37 }
  0xca   : > { %v620_v1 = vpop.permute.xlu2 %619 }
  0xcb   : > { %713 = vst.msk [vmem:[#allocation2 + $0x18] sm:$0xff] %vm709_vm4, %v620_v1 }
  0xcd   : > { %756 = vrot.lane.b32.xlu1 %v2154_v30, %s2041_s20 }
  0xce   : > { %754 = vrot.lane.b32.xlu0 %v2135_v22, %s2041_s20 }
  0xcf   : > { %v460_v47 = vpop.permute.xlu1 %459 }
  0xd0   : > { %528 = vst.msk [vmem:[#allocation2 + $0xe0] sm:$0xff] %vm499_vm3, %v460_v47  ;;  %v458_v23 = vpop.permute.xlu0 %457  ;;  %758 = vrot.lane.b32.xlu2 %v2160_v32, %s2041_s20 }
  0xd1   : > { %527 = vst.msk [vmem:[#allocation2 + $0xd8] sm:$0xff] %vm499_vm3, %v458_v23 }
  0xd2   : > { %v626_v4 = vpop.permute.xlu2 %625 }
  0xd3   : > { %716 = vst.msk [vmem:[#allocation2 + $0x30] sm:$0xff] %vm709_vm4, %v626_v4 }
  0xd5   : > { %762 = vrot.lane.b32.xlu1 %v2171_v35, %s2041_s20 }
  0xd6   : > { %760 = vrot.lane.b32.xlu0 %v2168_v34, %s2041_s20 }
  0xd7   : > { %v466_v40 = vpop.permute.xlu1 %465 }
  0xd8   : > { %531 = vst.msk [vmem:[#allocation2 + $0xf8] sm:$0xff] %vm499_vm3, %v466_v40  ;;  %v464_v57 = vpop.permute.xlu0 %463  ;;  %764 = vrot.lane.b32.xlu2 %v2207_v49, %s2041_s20 }
  0xd9   : > { %530 = vst.msk [vmem:[#allocation2 + $0xf0] sm:$0xff] %vm499_vm3, %v464_v57 }
  0xda   : > { %v632_v6 = vpop.permute.xlu2 %631 }
  0xdb   : > { %719 = vst.msk [vmem:[#allocation2 + $0x48] sm:$0xff] %vm709_vm4, %v632_v6 }
  0xdd   : > { %768 = vrot.lane.b32.xlu1 %v2220_v54, %s2041_s20 }
  0xde   : > { %766 = vrot.lane.b32.xlu0 %v2200_v46, %s2041_s20 }
  0xdf   : > { %v618_v55 = vpop.permute.xlu1 %617 }
  0xe0   : > { %712 = vst.msk [vmem:[#allocation2 + $0x10] sm:$0xff] %vm709_vm4, %v618_v55  ;;  %v616_v0 = vpop.permute.xlu0 %615  ;;  %770 = vrot.lane.b32.xlu2 %v2226_v56, %s2041_s20 }
  0xe1   : > { %711 = vst.msk [vmem:[#allocation2 + $0x8] sm:$0xff] %vm709_vm4, %v616_v0 }
  0xe2   : > { %v638_v37 = vpop.permute.xlu2 %637 }
  0xe3   : > { %722 = vst.msk [vmem:[#allocation2 + $0x60] sm:$0xff] %vm709_vm4, %v638_v37 }
  0xe5   : > { %774 = vrot.lane.b32.xlu1 %v2237_v59, %s2041_s20 }
  0xe6   : > { %772 = vrot.lane.b32.xlu0 %v2234_v58, %s2041_s20 }
  0xe7   : > { %v624_v1 = vpop.permute.xlu1 %623 }
  0xe8   : > { %715 = vst.msk [vmem:[#allocation2 + $0x28] sm:$0xff] %vm709_vm4, %v624_v1  ;;  %v622_v47 = vpop.permute.xlu0 %621  ;;  %776 = vrot.lane.b32.xlu2 %v2273_v21, %s2041_s20 }
  0xe9   : > { %714 = vst.msk [vmem:[#allocation2 + $0x20] sm:$0xff] %vm709_vm4, %v622_v47 }
  0xea   : > { %v644_v23 = vpop.permute.xlu2 %643 }
  0xeb   : > { %725 = vst.msk [vmem:[#allocation2 + $0x78] sm:$0xff] %vm709_vm4, %v644_v23 }
  0xed   : > { %780 = vrot.lane.b32.xlu1 %v2286_v36, %s2041_s20 }
  0xee   : > { %778 = vrot.lane.b32.xlu0 %v2266_v15, %s2041_s20 }
  0xef   : > { %v630_v4 = vpop.permute.xlu1 %629 }
  0xf0   : > { %718 = vst.msk [vmem:[#allocation2 + $0x40] sm:$0xff] %vm709_vm4, %v630_v4  ;;  %v628_v40 = vpop.permute.xlu0 %627  ;;  %782 = vrot.lane.b32.xlu2 %v2292_v39, %s2041_s20 }
  0xf1   : > { %717 = vst.msk [vmem:[#allocation2 + $0x38] sm:$0xff] %vm709_vm4, %v628_v40  ;;  %v2805_v40 = vld [vmem:[%s2081_s17 + $0x180] sm:$0xff] }
  0xf2   : > { %v650_v57 = vpop.permute.xlu2 %649 }
  0xf3   : > { %728 = vst.msk [vmem:[#allocation2 + $0x90] sm:$0xff] %vm709_vm4, %v650_v57 }
  0xf5   : > { %786 = vrot.lane.b32.xlu1 %v2303_v48, %s2041_s20 }
  0xf6   : > { %784 = vrot.lane.b32.xlu0 %v2300_v41, %s2041_s20 }
  0xf7   : > { %v636_v6 = vpop.permute.xlu1 %635 }
  0xf8   : > { %721 = vst.msk [vmem:[#allocation2 + $0x58] sm:$0xff] %vm709_vm4, %v636_v6  ;;  %v634_v55 = vpop.permute.xlu0 %633  ;;  %788 = vrot.lane.b32.xlu2 %v2339_v38, %s2041_s20 }
  0xf9   : > { %720 = vst.msk [vmem:[#allocation2 + $0x50] sm:$0xff] %vm709_vm4, %v634_v55  ;;  %v2815_v55 = vld [vmem:[%s2081_s17 + $0x188] sm:$0xff] }
  0xfa   : > { %v656_v0 = vpop.permute.xlu2 %655 }
  0xfb   : > { %731 = vst.msk [vmem:[#allocation2 + $0xa8] sm:$0xff] %vm709_vm4, %v656_v0 }
  0xfd   : > { %792 = vrot.lane.b32.xlu1 %v2352_v28, %s2041_s20 }
  0xfe   : > { %790 = vrot.lane.b32.xlu0 %v2332_v26, %s2041_s20 }
  0xff   : > { %v642_v37 = vpop.permute.xlu1 %641 }
 0x100   : > { %724 = vst.msk [vmem:[#allocation2 + $0x70] sm:$0xff] %vm709_vm4, %v642_v37  ;;  %v640_v1 = vpop.permute.xlu0 %639  ;;  %794 = vrot.lane.b32.xlu2 %v2358_v11, %s2041_s20 }
 0x101   : > { %723 = vst.msk [vmem:[#allocation2 + $0x68] sm:$0xff] %vm709_vm4, %v640_v1 }
 0x102   : > { %v662_v47 = vpop.permute.xlu2 %661 }
 0x103   : > { %734 = vst.msk [vmem:[#allocation2 + $0xc0] sm:$0xff] %vm709_vm4, %v662_v47 }
 0x105   : > { %798 = vrot.lane.b32.xlu1 %v2369_v62, %s2041_s20 }
 0x106   : > { %796 = vrot.lane.b32.xlu0 %v2366_v24, %s2041_s20 }
 0x107   : > { %v648_v23 = vpop.permute.xlu1 %647 }
 0x108   : > { %727 = vst.msk [vmem:[#allocation2 + $0x88] sm:$0xff] %vm709_vm4, %v648_v23  ;;  %v646_v4 = vpop.permute.xlu0 %645  ;;  %800 = vrot.lane.b32.xlu2 %v2405_v42, %s2041_s20 }
 0x109   : > { %726 = vst.msk [vmem:[#allocation2 + $0x80] sm:$0xff] %vm709_vm4, %v646_v4 }
 0x10a   : > { %v668_v57 = vpop.permute.xlu2 %667 }
 0x10b   : > { %737 = vst.msk [vmem:[#allocation2 + $0xd8] sm:$0xff] %vm709_vm4, %v668_v57  ;;  %v3553_v57 = vld [vmem:[#allocation5_spill] sm:$0xff] }
 0x10d   : > { %804 = vrot.lane.b32.xlu1 %v2805_v40, %s2041_s20 }
 0x10e   : > { %802 = vrot.lane.b32.xlu0 %v2398_v17, %s2041_s20 }
 0x10f   : > { %v654_v6 = vpop.permute.xlu1 %653 }
 0x110   : > { %730 = vst.msk [vmem:[#allocation2 + $0xa0] sm:$0xff] %vm709_vm4, %v654_v6  ;;  %v652_v0 = vpop.permute.xlu0 %651  ;;  %806 = vrot.lane.b32.xlu2 %v2815_v55, %s2041_s20  ;;  %v3554_v6 = vld [vmem:[#allocation3_spill] sm:$0xff] }
 0x111   : > { %729 = vst.msk [vmem:[#allocation2 + $0x98] sm:$0xff] %vm709_vm4, %v652_v0 }
 0x112   : > { %v674_v37 = vpop.permute.xlu2 %673 }
 0x113   : > { %740 = vst.msk [vmem:[#allocation2 + $0xf0] sm:$0xff] %vm709_vm4, %v674_v37 }
 0x115   : > { %881 = vrot.lane.b32.xlu1 %v2129_v20, %s2042_s21 }
 0x116   : > { %879 = vrot.lane.b32.xlu0 %v2103_v9, %s2042_s21 }
 0x117   : > { %v660_v1 = vpop.permute.xlu1 %659 }
 0x118   : > { %733 = vst.msk [vmem:[#allocation2 + $0xb8] sm:$0xff] %vm709_vm4, %v660_v1  ;;  %v658_v47 = vpop.permute.xlu0 %657  ;;  %883 = vrot.lane.b32.xlu2 %v2126_v19, %s2042_s21  ;;  %v3555_v1 = vld [vmem:[#allocation4_spill] sm:$0xff] }
 0x119   : > { %732 = vst.msk [vmem:[#allocation2 + $0xb0] sm:$0xff] %vm709_vm4, %v658_v47 }
 0x11a   : > { %v747_v23 = vpop.permute.xlu2 %746 }
 0x11b   : > { %842 = vst.msk [vmem:[#allocation2 + $0x8] sm:$0xff] %vm840_vm5, %v747_v23  ;;  %v3556_v23 = vld [vmem:[#allocation8_spill] sm:$0xff] }
 0x11d   : > { %887 = vrot.lane.b32.xlu1 %v2165_v33, %s2042_s21 }
 0x11e   : > { %885 = vrot.lane.b32.xlu0 %v2151_v29, %s2042_s21 }
 0x11f   : > { %v666_v9 = vpop.permute.xlu1 %665 }
 0x120   : > { %736 = vst.msk [vmem:[#allocation2 + $0xd0] sm:$0xff] %vm709_vm4, %v666_v9  ;;  %v664_v20 = vpop.permute.xlu0 %663  ;;  %889 = vrot.lane.b32.xlu2 %v2157_v31, %s2042_s21  ;;  %v3557_v9 = vld [vmem:[#allocation6_spill] sm:$0xff] }
 0x121   : > { %735 = vst.msk [vmem:[#allocation2 + $0xc8] sm:$0xff] %vm709_vm4, %v664_v20 }
 0x122   : > { %v753_v4 = vpop.permute.xlu2 %752 }
 0x123   : > { %845 = vst.msk [vmem:[#allocation2 + $0x20] sm:$0xff] %vm840_vm5, %v753_v4 }
 0x125   : > { %893 = vrot.lane.b32.xlu1 %v3553_v57, %s2042_s21 }
 0x126   : > { %891 = vrot.lane.b32.xlu0 %v3554_v6, %s2042_s21 }
 0x127   : > { %v672_v0 = vpop.permute.xlu1 %671 }
 0x128   : > { %739 = vst.msk [vmem:[#allocation2 + $0xe8] sm:$0xff] %vm709_vm4, %v672_v0  ;;  %v670_v37 = vpop.permute.xlu0 %669  ;;  %895 = vrot.lane.b32.xlu2 %v3555_v1, %s2042_s21  ;;  %v3558_v0 = vld [vmem:[#allocation7_spill] sm:$0xff] }
 0x129   : > { %738 = vst.msk [vmem:[#allocation2 + $0xe0] sm:$0xff] %vm709_vm4, %v670_v37  ;;  %v3559_v1 = vld [vmem:[#allocation11_spill] sm:$0xff] }
 0x12a   : > { %v759_v47 = vpop.permute.xlu2 %758 }
 0x12b   : > { %848 = vst.msk [vmem:[#allocation2 + $0x38] sm:$0xff] %vm840_vm5, %v759_v47  ;;  %v3560_v47 = vld [vmem:[#allocation9_spill] sm:$0xff] }
 0x12d   : > { %899 = vrot.lane.b32.xlu1 %v3556_v23, %s2042_s21 }
 0x12e   : > { %897 = vrot.lane.b32.xlu0 %v3557_v9, %s2042_s21 }
 0x12f   : > { %v745_v20 = vpop.permute.xlu1 %744 }
 0x130   : > { %841 = vst.msk [vmem:[#allocation2] sm:$0xff] %vm840_vm5, %v745_v20  ;;  %v676_v4 = vpop.permute.xlu0 %675  ;;  %901 = vrot.lane.b32.xlu2 %v3558_v0, %s2042_s21  ;;  %v3561_v20 = vld [vmem:[#allocation10_spill] sm:$0xff] }
 0x131   : > { %741 = vst.msk [vmem:[#allocation2 + $0xf8] sm:$0xff] %vm709_vm4, %v676_v4  ;;  %v3562_v0 = vld [vmem:[#allocation14_spill] sm:$0xff] }
 0x132   : > { %v765_v37 = vpop.permute.xlu2 %764 }
 0x133   : > { %851 = vst.msk [vmem:[#allocation2 + $0x50] sm:$0xff] %vm840_vm5, %v765_v37  ;;  %v3563_v37 = vld [vmem:[#allocation12_spill] sm:$0xff] }
 0x135   : > { %905 = vrot.lane.b32.xlu1 %v3559_v1, %s2042_s21 }
 0x136   : > { %903 = vrot.lane.b32.xlu0 %v3560_v47, %s2042_s21 }
 0x137   : > { %v751_v23 = vpop.permute.xlu1 %750 }
 0x138   : > { %844 = vst.msk [vmem:[#allocation2 + $0x18] sm:$0xff] %vm840_vm5, %v751_v23  ;;  %v749_v9 = vpop.permute.xlu0 %748  ;;  %907 = vrot.lane.b32.xlu2 %v3561_v20, %s2042_s21  ;;  %v3564_v23 = vld [vmem:[#allocation13_spill] sm:$0xff] }
 0x139   : > { %843 = vst.msk [vmem:[#allocation2 + $0x10] sm:$0xff] %vm840_vm5, %v749_v9  ;;  %v3565_v20 = vld [vmem:[#allocation17_spill] sm:$0xff] }
 0x13a   : > { %v771_v4 = vpop.permute.xlu2 %770 }
 0x13b   : > { %854 = vst.msk [vmem:[#allocation2 + $0x68] sm:$0xff] %vm840_vm5, %v771_v4  ;;  %v3566_v4 = vld [vmem:[#allocation15_spill] sm:$0xff] }
 0x13d   : > { %911 = vrot.lane.b32.xlu1 %v3562_v0, %s2042_s21 }
 0x13e   : > { %909 = vrot.lane.b32.xlu0 %v3563_v37, %s2042_s21 }
 0x13f   : > { %v757_v1 = vpop.permute.xlu1 %756 }
 0x140   : > { %847 = vst.msk [vmem:[#allocation2 + $0x30] sm:$0xff] %vm840_vm5, %v757_v1  ;;  %v755_v47 = vpop.permute.xlu0 %754  ;;  %913 = vrot.lane.b32.xlu2 %v3564_v23, %s2042_s21  ;;  %v3567_v1 = vld [vmem:[#allocation16_spill] sm:$0xff] }
 0x141   : > { %846 = vst.msk [vmem:[#allocation2 + $0x28] sm:$0xff] %vm840_vm5, %v755_v47  ;;  %v3568_v23 = vld [vmem:[#allocation20_spill] sm:$0xff] }
 0x142   : > { %v777_v9 = vpop.permute.xlu2 %776 }
 0x143   : > { %857 = vst.msk [vmem:[#allocation2 + $0x80] sm:$0xff] %vm840_vm5, %v777_v9  ;;  %v3569_v9 = vld [vmem:[#allocation18_spill] sm:$0xff] }
 0x145   : > { %917 = vrot.lane.b32.xlu1 %v3565_v20, %s2042_s21 }
 0x146   : > { %915 = vrot.lane.b32.xlu0 %v3566_v4, %s2042_s21  ;;  %v3571_v4 = vld [vmem:[#allocation23_spill] sm:$0xff] }
 0x147   : > { %v763_v0 = vpop.permute.xlu1 %762 }
 0x148   : > { %850 = vst.msk [vmem:[#allocation2 + $0x48] sm:$0xff] %vm840_vm5, %v763_v0  ;;  %v761_v37 = vpop.permute.xlu0 %760  ;;  %919 = vrot.lane.b32.xlu2 %v3567_v1, %s2042_s21 }
 0x149   : > { %849 = vst.msk [vmem:[#allocation2 + $0x40] sm:$0xff] %vm840_vm5, %v761_v37  ;;  %v3570_v37 = vld [vmem:[#allocation19_spill] sm:$0xff] }
 0x14a   : > { %v783_v47 = vpop.permute.xlu2 %782 }
 0x14b   : > { %860 = vst.msk [vmem:[#allocation2 + $0x98] sm:$0xff] %vm840_vm5, %v783_v47  ;;  %v3572_v47 = vld [vmem:[#allocation21_spill] sm:$0xff] }
 0x14d   : > { %923 = vrot.lane.b32.xlu1 %v3568_v23, %s2042_s21 }
 0x14e   : > { %921 = vrot.lane.b32.xlu0 %v3569_v9, %s2042_s21 }
 0x14f   : > { %v769_v20 = vpop.permute.xlu1 %768 }
 0x150   : > { %853 = vst.msk [vmem:[#allocation2 + $0x60] sm:$0xff] %vm840_vm5, %v769_v20  ;;  %v767_v0 = vpop.permute.xlu0 %766  ;;  %925 = vrot.lane.b32.xlu2 %v3570_v37, %s2042_s21  ;;  %v3573_v20 = vld [vmem:[#allocation22_spill] sm:$0xff] }
 0x151   : > { %852 = vst.msk [vmem:[#allocation2 + $0x58] sm:$0xff] %vm840_vm5, %v767_v0  ;;  %v2903_v0 = vld [vmem:[%s2081_s17 + $0x190] sm:$0x3] }
 0x152   : > { %v789_v1 = vpop.permute.xlu2 %788 }
 0x153   : > { %863 = vst.msk [vmem:[#allocation2 + $0xb0] sm:$0xff] %vm840_vm5, %v789_v1  ;;  %v875_v1 = vrot.slane %v2815_v55, 1 }
 0x155   : > { %929 = vrot.lane.b32.xlu1 %v3571_v4, %s2042_s21 }
 0x156   : > { %927 = vrot.lane.b32.xlu0 %v3572_v47, %s2042_s21 }
 0x157   : > { %v775_v23 = vpop.permute.xlu1 %774 }
 0x158   : > { %856 = vst.msk [vmem:[#allocation2 + $0x78] sm:$0xff] %vm840_vm5, %v775_v23  ;;  %v773_v9 = vpop.permute.xlu0 %772  ;;  %931 = vrot.lane.b32.xlu2 %v3573_v20, %s2042_s21  ;;  %v877_v23 = vrot.slane %v2903_v0, 1 }
 0x159   : > { %855 = vst.msk [vmem:[#allocation2 + $0x70] sm:$0xff] %vm840_vm5, %v773_v9  ;;  %v874_v9 = vrot.slane %v2805_v40, 1 }
 0x15a   : > { %v795_v37 = vpop.permute.xlu2 %794  ;;  %v2916_v20 = vsel %vm322_vm0, %v875_v1, %v877_v23 }
 0x15b   : > { %866 = vst.msk [vmem:[#allocation2 + $0xc8] sm:$0xff] %vm840_vm5, %v795_v37  ;;  %v2921_v37 = vsel %vm322_vm0, %v874_v9, %v875_v1  ;;  %v3576_v9 = vld [vmem:[#allocation26_spill] sm:$0xff] }
 0x15c   : > { %3574 = vst [vmem:[#allocation5_spill] sm:$0xff] %v2916_v20 }
 0x15d   : > { %935 = vrot.lane.b32.xlu1 %v2423_v53, %s2042_s21  ;;  %3575 = vst [vmem:[#allocation3_spill] sm:$0xff] %v2921_v37 }
 0x15e   : > { %933 = vrot.lane.b32.xlu0 %v2415_v60, %s2042_s21 }
 0x15f   : > { %v781_v4 = vpop.permute.xlu1 %780 }
 0x160   : > { %859 = vst.msk [vmem:[#allocation2 + $0x90] sm:$0xff] %vm840_vm5, %v781_v4  ;;  %v779_v47 = vpop.permute.xlu0 %778  ;;  %937 = vrot.lane.b32.xlu2 %v2418_v12, %s2042_s21 }
 0x161   : > { %858 = vst.msk [vmem:[#allocation2 + $0x88] sm:$0xff] %vm840_vm5, %v779_v47 }
 0x162   : > { %v801_v53 = vpop.permute.xlu2 %800 }
 0x163   : > { %869 = vst.msk [vmem:[#allocation2 + $0xe0] sm:$0xff] %vm840_vm5, %v801_v53 }
 0x165   : > { %941 = vrot.lane.b32.xlu1 %v2916_v20, %s2042_s21  ;;  %v3580_v20 = vld [vmem:[#allocation32_spill] sm:$0xff] }
 0x166   : > { %939 = vrot.lane.b32.xlu0 %v2921_v37, %s2042_s21 }
 0x167   : > { %v787_v4 = vpop.permute.xlu1 %786 }
 0x168   : > { %862 = vst.msk [vmem:[#allocation2 + $0xa8] sm:$0xff] %vm840_vm5, %v787_v4  ;;  %v785_v47 = vpop.permute.xlu0 %784  ;;  %1013 = vrot.lane.b32.xlu2 %v2442_v3, %s2043_s22  ;;  %v3577_v4 = vld [vmem:[#allocation29_spill] sm:$0xff] }
 0x169   : > { %861 = vst.msk [vmem:[#allocation2 + $0xa0] sm:$0xff] %vm840_vm5, %v785_v47  ;;  %v3578_v47 = vld [vmem:[#allocation27_spill] sm:$0xff] }
 0x16a   : > { %v807_v1 = vpop.permute.xlu2 %806 }
 0x16b   : > { %872 = vst.msk [vmem:[#allocation2 + $0xf8] sm:$0xff] %vm840_vm5, %v807_v1 }
 0x16d   : > { %1017 = vrot.lane.b32.xlu1 %v2480_v18, %s2043_s22 }
 0x16e   : > { %1015 = vrot.lane.b32.xlu0 %v2464_v45, %s2043_s22 }
 0x16f   : > { %v793_v53 = vpop.permute.xlu1 %792 }
 0x170   : > { %865 = vst.msk [vmem:[#allocation2 + $0xc0] sm:$0xff] %vm840_vm5, %v793_v53  ;;  %v791_v23 = vpop.permute.xlu0 %790  ;;  %1019 = vrot.lane.b32.xlu2 %v3576_v9, %s2043_s22  ;;  %v3579_v53 = vld [vmem:[#allocation28_spill] sm:$0xff] }
 0x171   : > { %864 = vst.msk [vmem:[#allocation2 + $0xb8] sm:$0xff] %vm840_vm5, %v791_v23 }
 0x172   : > { %v884_v3 = vpop.permute.xlu2 %883 }
 0x173   : > { %978 = vst.msk [vmem:[#allocation2 + $0x10] sm:$0xff] %vm975_vm6, %v884_v3  ;;  %v3581_v3 = vld [vmem:[#allocation30_spill] sm:$0xff] }
 0x175   : > { %1023 = vrot.lane.b32.xlu1 %v3577_v4, %s2043_s22 }
 0x176   : > { %1021 = vrot.lane.b32.xlu0 %v3578_v47, %s2043_s22 }
 0x177   : > { %v799_v45 = vpop.permute.xlu1 %798 }
 0x178   : > { %868 = vst.msk [vmem:[#allocation2 + $0xd8] sm:$0xff] %vm840_vm5, %v799_v45  ;;  %v797_v1 = vpop.permute.xlu0 %796  ;;  %1025 = vrot.lane.b32.xlu2 %v3579_v53, %s2043_s22  ;;  %v3582_v45 = vld [vmem:[#allocation31_spill] sm:$0xff] }
 0x179   : > { %867 = vst.msk [vmem:[#allocation2 + $0xd0] sm:$0xff] %vm840_vm5, %v797_v1 }
 0x17a   : > { %v890_v23 = vpop.permute.xlu2 %889 }
 0x17b   : > { %981 = vst.msk [vmem:[#allocation2 + $0x28] sm:$0xff] %vm975_vm6, %v890_v23 }
 0x17d   : > { %1029 = vrot.lane.b32.xlu1 %v3580_v20, %s2043_s22 }
 0x17e   : > { %1027 = vrot.lane.b32.xlu0 %v3581_v3, %s2043_s22 }
 0x17f   : > { %v805_v37 = vpop.permute.xlu1 %804 }
 0x180   : > { %871 = vst.msk [vmem:[#allocation2 + $0xf0] sm:$0xff] %vm840_vm5, %v805_v37  ;;  %v803_v12 = vpop.permute.xlu0 %802  ;;  %1031 = vrot.lane.b32.xlu2 %v3582_v45, %s2043_s22  ;;  %v3583_v37 = vld [vmem:[#allocation33_spill] sm:$0xff] }
 0x181   : > { %870 = vst.msk [vmem:[#allocation2 + $0xe8] sm:$0xff] %vm840_vm5, %v803_v12 }
 0x182   : > { %v896_v1 = vpop.permute.xlu2 %895 }
 0x183   : > { %984 = vst.msk [vmem:[#allocation2 + $0x40] sm:$0xff] %vm975_vm6, %v896_v1 }
 0x185   : > { %1035 = vrot.lane.b32.xlu1 %v2583_v52, %s2043_s22 }
 0x186   : > { %1033 = vrot.lane.b32.xlu0 %v2572_v5, %s2043_s22 }
 0x187   : > { %v882_v23 = vpop.permute.xlu1 %881 }
 0x188   : > { %977 = vst.msk [vmem:[#allocation2 + $0x8] sm:$0xff] %vm975_vm6, %v882_v23  ;;  %v880_v20 = vpop.permute.xlu0 %879  ;;  %1037 = vrot.lane.b32.xlu2 %v2577_v43, %s2043_s22 }
 0x189   : > { %976 = vst.msk [vmem:[#allocation2] sm:$0xff] %vm975_vm6, %v880_v20  ;;  %v3584_v20 = vld [vmem:[#allocation34_spill] sm:$0xff] }
 0x18a   : > { %v902_v12 = vpop.permute.xlu2 %901 }
 0x18b   : > { %987 = vst.msk [vmem:[#allocation2 + $0x58] sm:$0xff] %vm975_vm6, %v902_v12 }
 0x18d   : > { %1041 = vrot.lane.b32.xlu1 %v2606_v50, %s2043_s22 }
 0x18e   : > { %1039 = vrot.lane.b32.xlu0 %v3583_v37, %s2043_s22 }
 0x18f   : > { %v888_v1 = vpop.permute.xlu1 %887 }
 0x190   : > { %980 = vst.msk [vmem:[#allocation2 + $0x20] sm:$0xff] %vm975_vm6, %v888_v1  ;;  %v886_v45 = vpop.permute.xlu0 %885  ;;  %1043 = vrot.lane.b32.xlu2 %v3584_v20, %s2043_s22 }
 0x191   : > { %979 = vst.msk [vmem:[#allocation2 + $0x18] sm:$0xff] %vm975_vm6, %v886_v45  ;;  %v3585_v45 = vld [vmem:[#allocation37_spill] sm:$0xff] }
 0x192   : > { %v908_v23 = vpop.permute.xlu2 %907 }
 0x193   : > { %990 = vst.msk [vmem:[#allocation2 + $0x70] sm:$0xff] %vm975_vm6, %v908_v23  ;;  %v3586_v23 = vld [vmem:[#allocation39_spill] sm:$0xff] }
 0x195   : > { %1047 = vrot.lane.b32.xlu1 %v2629_v10, %s2043_s22 }
 0x196   : > { %1045 = vrot.lane.b32.xlu0 %v2619_v8, %s2043_s22 }
 0x197   : > { %v894_v12 = vpop.permute.xlu1 %893 }
 0x198   : > { %983 = vst.msk [vmem:[#allocation2 + $0x38] sm:$0xff] %vm975_vm6, %v894_v12  ;;  %v892_v50 = vpop.permute.xlu0 %891  ;;  %1049 = vrot.lane.b32.xlu2 %v3585_v45, %s2043_s22 }
 0x199   : > { %982 = vst.msk [vmem:[#allocation2 + $0x30] sm:$0xff] %vm975_vm6, %v892_v50  ;;  %v3587_v50 = vld [vmem:[#allocation40_spill] sm:$0xff] }
 0x19a   : > { %v914_v1 = vpop.permute.xlu2 %913 }
 0x19b   : > { %993 = vst.msk [vmem:[#allocation2 + $0x88] sm:$0xff] %vm975_vm6, %v914_v1 }
 0x19d   : > { %1053 = vrot.lane.b32.xlu1 %v2651_v16, %s2043_s22 }
 0x19e   : > { %1051 = vrot.lane.b32.xlu0 %v3586_v23, %s2043_s22 }
 0x19f   : > { %v900_v10 = vpop.permute.xlu1 %899 }
 0x1a0   : > { %986 = vst.msk [vmem:[#allocation2 + $0x50] sm:$0xff] %vm975_vm6, %v900_v10  ;;  %v898_v8 = vpop.permute.xlu0 %897  ;;  %1055 = vrot.lane.b32.xlu2 %v3587_v50, %s2043_s22  ;;  %v3588_v10 = vld [vmem:[#allocation41_spill] sm:$0xff] }
 0x1a1   : > { %985 = vst.msk [vmem:[#allocation2 + $0x48] sm:$0xff] %vm975_vm6, %v898_v8 }
 0x1a2   : > { %v920_v12 = vpop.permute.xlu2 %919 }
 0x1a3   : > { %996 = vst.msk [vmem:[#allocation2 + $0xa0] sm:$0xff] %vm975_vm6, %v920_v12 }
 0x1a5   : > { %1059 = vrot.lane.b32.xlu1 %v2674_v44, %s2043_s22 }
 0x1a6   : > { %1057 = vrot.lane.b32.xlu0 %v2664_v61, %s2043_s22 }
 0x1a7   : > { %v906_v1 = vpop.permute.xlu1 %905 }
 0x1a8   : > { %989 = vst.msk [vmem:[#allocation2 + $0x68] sm:$0xff] %vm975_vm6, %v906_v1  ;;  %v904_v20 = vpop.permute.xlu0 %903  ;;  %1061 = vrot.lane.b32.xlu2 %v3588_v10, %s2043_s22  ;;  %v1009_v10 = vrot.slane %v2815_v55, 2 }
 0x1a9   : > { %988 = vst.msk [vmem:[#allocation2 + $0x60] sm:$0xff] %vm975_vm6, %v904_v20  ;;  %v1008_v20 = vrot.slane %v2805_v40, 2 }
 0x1aa   : > { %v926_v8 = vpop.permute.xlu2 %925 }
 0x1ab   : > { %999 = vst.msk [vmem:[#allocation2 + $0xb8] sm:$0xff] %vm975_vm6, %v926_v8 }
 0x1ad   : > { %1065 = vrot.lane.b32.xlu1 %v2696_v27, %s2043_s22 }
 0x1ae   : > { %1063 = vrot.lane.b32.xlu0 %v2686_v63, %s2043_s22 }
 0x1af   : > { %v912_v12 = vpop.permute.xlu1 %911 }
 0x1b0   : > { %992 = vst.msk [vmem:[#allocation2 + $0x80] sm:$0xff] %vm975_vm6, %v912_v12  ;;  %v910_v37 = vpop.permute.xlu0 %909  ;;  %1067 = vrot.lane.b32.xlu2 %v2691_v7, %s2043_s22  ;;  %v1011_v12 = vrot.slane %v2903_v0, 2 }
 0x1b1   : > { %991 = vst.msk [vmem:[#allocation2 + $0x78] sm:$0xff] %vm975_vm6, %v910_v37  ;;  %v3022_v37 = vsel %vm532_vm1, %v1008_v20, %v1009_v10 }
 0x1b2   : > { %v932_v1 = vpop.permute.xlu2 %931 }
 0x1b3   : > { %1002 = vst.msk [vmem:[#allocation2 + $0xd0] sm:$0xff] %vm975_vm6, %v932_v1 }
 0x1b5   : > { %1071 = vrot.lane.b32.xlu1 %v2714_v51, %s2043_s22  ;;  %v3029_v51 = vsel %vm532_vm1, %v1009_v10, %v1011_v12 }
 0x1b6   : > { %1069 = vrot.lane.b32.xlu0 %v2707_v2, %s2043_s22 }
 0x1b7   : > { %v918_v8 = vpop.permute.xlu1 %917 }
 0x1b8   : > { %995 = vst.msk [vmem:[#allocation2 + $0x98] sm:$0xff] %vm975_vm6, %v918_v8  ;;  %v916_v63 = vpop.permute.xlu0 %915  ;;  %1073 = vrot.lane.b32.xlu2 %v3022_v37, %s2043_s22 }
 0x1b9   : > { %994 = vst.msk [vmem:[#allocation2 + $0x90] sm:$0xff] %vm975_vm6, %v916_v63 }
 0x1ba   : > { %v938_v1 = vpop.permute.xlu2 %937 }
 0x1bb   : > { %1005 = vst.msk [vmem:[#allocation2 + $0xe8] sm:$0xff] %vm975_vm6, %v938_v1 }
 0x1bd   : > { %1144 = vrot.lane.b32.xlu1 %v2114_v13, %s2044_s23 }
 0x1be   : > { %1075 = vrot.lane.b32.xlu0 %v3029_v51, %s2043_s22 }
 0x1bf   : > { %v924_v0 = vpop.permute.xlu1 %923 }
 0x1c0   : > { %998 = vst.msk [vmem:[#allocation2 + $0xb0] sm:$0xff] %vm975_vm6, %v924_v0  ;;  %v922_v63 = vpop.permute.xlu0 %921  ;;  %1146 = vrot.lane.b32.xlu2 %v2117_v14, %s2044_s23 }
 0x1c1   : > { %997 = vst.msk [vmem:[#allocation2 + $0xa8] sm:$0xff] %vm975_vm6, %v922_v63 }
 0x1c2   : > { %v1014_v10 = vpop.permute.xlu2 %1013 }
 0x1c3   : > { %1110 = vst.msk [vmem:[#allocation2] sm:$0xff] %vm1109_vm7, %v1014_v10  ;;  %v3590_v10 = vld [vmem:[#allocation4_spill] sm:$0xff] }
 0x1c5   : > { %1150 = vrot.lane.b32.xlu1 %v2135_v22, %s2044_s23 }
 0x1c6   : > { %1148 = vrot.lane.b32.xlu0 %v2142_v25, %s2044_s23 }
 0x1c7   : > { %v930_v13 = vpop.permute.xlu1 %929 }
 0x1c8   : > { %1001 = vst.msk [vmem:[#allocation2 + $0xc8] sm:$0xff] %vm975_vm6, %v930_v13  ;;  %v928_v20 = vpop.permute.xlu0 %927  ;;  %1152 = vrot.lane.b32.xlu2 %v2154_v30, %s2044_s23  ;;  %v3591_v13 = vld [vmem:[#allocation17_spill] sm:$0xff] }
 0x1c9   : > { %1000 = vst.msk [vmem:[#allocation2 + $0xc0] sm:$0xff] %vm975_vm6, %v928_v20 }
 0x1ca   : > { %v1020_v14 = vpop.permute.xlu2 %1019 }
 0x1cb   : > { %1113 = vst.msk [vmem:[#allocation2 + $0x18] sm:$0xff] %vm1109_vm7, %v1020_v14 }
 0x1cd   : > { %1156 = vrot.lane.b32.xlu1 %v2168_v34, %s2044_s23 }
 0x1ce   : > { %1154 = vrot.lane.b32.xlu0 %v2160_v32, %s2044_s23 }
 0x1cf   : > { %v936_v22 = vpop.permute.xlu1 %935 }
 0x1d0   : > { %1004 = vst.msk [vmem:[#allocation2 + $0xe0] sm:$0xff] %vm975_vm6, %v936_v22  ;;  %v934_v25 = vpop.permute.xlu0 %933  ;;  %1158 = vrot.lane.b32.xlu2 %v2171_v35, %s2044_s23  ;;  %v3592_v22 = vld [vmem:[#allocation16_spill] sm:$0xff] }
 0x1d1   : > { %1003 = vst.msk [vmem:[#allocation2 + $0xd8] sm:$0xff] %vm975_vm6, %v934_v25 }
 0x1d2   : > { %v1026_v8 = vpop.permute.xlu2 %1025 }
 0x1d3   : > { %1116 = vst.msk [vmem:[#allocation2 + $0x30] sm:$0xff] %vm1109_vm7, %v1026_v8 }
 0x1d5   : > { %1162 = vrot.lane.b32.xlu1 %v2200_v46, %s2044_s23 }
 0x1d6   : > { %1160 = vrot.lane.b32.xlu0 %v2207_v49, %s2044_s23 }
 0x1d7   : > { %v942_v30 = vpop.permute.xlu1 %941 }
 0x1d8   : > { %1007 = vst.msk [vmem:[#allocation2 + $0xf8] sm:$0xff] %vm975_vm6, %v942_v30  ;;  %v940_v32 = vpop.permute.xlu0 %939  ;;  %1164 = vrot.lane.b32.xlu2 %v2220_v54, %s2044_s23 }
 0x1d9   : > { %1006 = vst.msk [vmem:[#allocation2 + $0xf0] sm:$0xff] %vm975_vm6, %v940_v32  ;;  %v3594_v32 = vld [vmem:[#allocation22_spill] sm:$0xff] }
 0x1da   : > { %v1032_v34 = vpop.permute.xlu2 %1031 }
 0x1db   : > { %1119 = vst.msk [vmem:[#allocation2 + $0x48] sm:$0xff] %vm1109_vm7, %v1032_v34 }
 0x1dd   : > { %1168 = vrot.lane.b32.xlu1 %v2234_v58, %s2044_s23 }
 0x1de   : > { %1166 = vrot.lane.b32.xlu0 %v2226_v56, %s2044_s23 }
 0x1df   : > { %v1018_v35 = vpop.permute.xlu1 %1017 }
 0x1e0   : > { %1112 = vst.msk [vmem:[#allocation2 + $0x10] sm:$0xff] %vm1109_vm7, %v1018_v35  ;;  %v1016_v46 = vpop.permute.xlu0 %1015  ;;  %1170 = vrot.lane.b32.xlu2 %v2237_v59, %s2044_s23  ;;  %v3595_v35 = vld [vmem:[#allocation8_spill] sm:$0xff] }
 0x1e1   : > { %1111 = vst.msk [vmem:[#allocation2 + $0x8] sm:$0xff] %vm1109_vm7, %v1016_v46 }
 0x1e2   : > { %v1038_v49 = vpop.permute.xlu2 %1037 }
 0x1e3   : > { %1122 = vst.msk [vmem:[#allocation2 + $0x60] sm:$0xff] %vm1109_vm7, %v1038_v49  ;;  %v3596_v49 = vld [vmem:[#allocation20_spill] sm:$0xff] }
 0x1e5   : > { %1174 = vrot.lane.b32.xlu1 %v2266_v15, %s2044_s23 }
 0x1e6   : > { %1172 = vrot.lane.b32.xlu0 %v2273_v21, %s2044_s23 }
 0x1e7   : > { %v1024_v54 = vpop.permute.xlu1 %1023 }
 0x1e8   : > { %1115 = vst.msk [vmem:[#allocation2 + $0x28] sm:$0xff] %vm1109_vm7, %v1024_v54  ;;  %v1022_v56 = vpop.permute.xlu0 %1021  ;;  %1176 = vrot.lane.b32.xlu2 %v2286_v36, %s2044_s23 }
 0x1e9   : > { %1114 = vst.msk [vmem:[#allocation2 + $0x20] sm:$0xff] %vm1109_vm7, %v1022_v56 }
 0x1ea   : > { %v1044_v58 = vpop.permute.xlu2 %1043 }
 0x1eb   : > { %1125 = vst.msk [vmem:[#allocation2 + $0x78] sm:$0xff] %vm1109_vm7, %v1044_v58 }
 0x1ed   : > { %1180 = vrot.lane.b32.xlu1 %v2300_v41, %s2044_s23 }
 0x1ee   : > { %1178 = vrot.lane.b32.xlu0 %v2292_v39, %s2044_s23 }
 0x1ef   : > { %v1030_v59 = vpop.permute.xlu1 %1029 }
 0x1f0   : > { %1118 = vst.msk [vmem:[#allocation2 + $0x40] sm:$0xff] %vm1109_vm7, %v1030_v59  ;;  %v1028_v15 = vpop.permute.xlu0 %1027  ;;  %1182 = vrot.lane.b32.xlu2 %v2303_v48, %s2044_s23 }
 0x1f1   : > { %1117 = vst.msk [vmem:[#allocation2 + $0x38] sm:$0xff] %vm1109_vm7, %v1028_v15 }
 0x1f2   : > { %v1050_v21 = vpop.permute.xlu2 %1049 }
 0x1f3   : > { %1128 = vst.msk [vmem:[#allocation2 + $0x90] sm:$0xff] %vm1109_vm7, %v1050_v21 }
 0x1f5   : > { %1186 = vrot.lane.b32.xlu1 %v2332_v26, %s2044_s23  ;;  %v3120_v26 = vld [vmem:[%s2081_s17 + $0x198] sm:$0xff] }
 0x1f6   : > { %1184 = vrot.lane.b32.xlu0 %v2339_v38, %s2044_s23 }
 0x1f7   : > { %v1036_v36 = vpop.permute.xlu1 %1035 }
 0x1f8   : > { %1121 = vst.msk [vmem:[#allocation2 + $0x58] sm:$0xff] %vm1109_vm7, %v1036_v36  ;;  %v1034_v39 = vpop.permute.xlu0 %1033  ;;  %1188 = vrot.lane.b32.xlu2 %v2352_v28, %s2044_s23 }
 0x1f9   : > { %1120 = vst.msk [vmem:[#allocation2 + $0x50] sm:$0xff] %vm1109_vm7, %v1034_v39 }
 0x1fa   : > { %v1056_v41 = vpop.permute.xlu2 %1055 }
 0x1fb   : > { %1131 = vst.msk [vmem:[#allocation2 + $0xa8] sm:$0xff] %vm1109_vm7, %v1056_v41 }
 0x1fd   : > { %1192 = vrot.lane.b32.xlu1 %v2366_v24, %s2044_s23 }
 0x1fe   : > { %1190 = vrot.lane.b32.xlu0 %v2358_v11, %s2044_s23 }
 0x1ff   : > { %v1042_v38 = vpop.permute.xlu1 %1041 }
 0x200   : > { %1124 = vst.msk [vmem:[#allocation2 + $0x70] sm:$0xff] %vm1109_vm7, %v1042_v38  ;;  %v1040_v48 = vpop.permute.xlu0 %1039  ;;  %1194 = vrot.lane.b32.xlu2 %v2369_v62, %s2044_s23  ;;  %v3601_v38 = vld [vmem:[#allocation21_spill] sm:$0xff] }
 0x201   : > { %1123 = vst.msk [vmem:[#allocation2 + $0x68] sm:$0xff] %vm1109_vm7, %v1040_v48 }
 0x202   : > { %v1062_v28 = vpop.permute.xlu2 %1061 }
 0x203   : > { %1134 = vst.msk [vmem:[#allocation2 + $0xc0] sm:$0xff] %vm1109_vm7, %v1062_v28  ;;  %v186_v28 = vld [vmem:[%s3432_s1 + $0x20] sm:$0xf] }
 0x204   : > { %2000 = vmatpush.msk.msra.mxu2 %vm1671_vm10, %v186_v28  ;;  %1963 = vmatpush.msk.msra.mxu0 %vm1671_vm10, %v186_v28 }
 0x205   : > { %1198 = vrot.lane.b32.xlu1 %v2398_v17, %s2044_s23  ;;  %v3130_v17 = vld [vmem:[%s2081_s17 + $0x1a0] sm:$0xff]  ;;  %2001 = vmatpush.msk.msra.mxu3 %vm1671_vm10, %v186_v28 }
 0x206   : > { %1196 = vrot.lane.b32.xlu0 %v2405_v42, %s2044_s23  ;;  %1999 = vmatpush.msk.msra.mxu1 %vm1671_vm10, %v186_v28 }
 0x207   : > { %v1048_v11 = vpop.permute.xlu1 %1047 }
 0x208   : > { %1127 = vst.msk [vmem:[#allocation2 + $0x88] sm:$0xff] %vm1109_vm7, %v1048_v11  ;;  %v1046_v24 = vpop.permute.xlu0 %1045  ;;  %1200 = vrot.lane.b32.xlu2 %v2805_v40, %s2044_s23  ;;  %v184_v11 = vld [vmem:[%s3432_s1 + $0x10] sm:$0xff] }
 0x209   : > { %1126 = vst.msk [vmem:[#allocation2 + $0x80] sm:$0xff] %vm1109_vm7, %v1046_v24 }
 0x20a   : > { %v1068_v62 = vpop.permute.xlu2 %1067 }
 0x20b   : > { %1137 = vst.msk [vmem:[#allocation2 + $0xd8] sm:$0xff] %vm1109_vm7, %v1068_v62  ;;  %v183_v62 = vld [vmem:[%s3432_s1 + $0x8] sm:$0xff] }
 0x20d   : > { %1204 = vrot.lane.b32.xlu1 %v3120_v26, %s2044_s23 }
 0x20e   : > { %1202 = vrot.lane.b32.xlu0 %v2815_v55, %s2044_s23 }
 0x20f   : > { %v1054_v42 = vpop.permute.xlu1 %1053 }
 0x210   : > { %1130 = vst.msk [vmem:[#allocation2 + $0xa0] sm:$0xff] %vm1109_vm7, %v1054_v42  ;;  %v1052_v12 = vpop.permute.xlu0 %1051  ;;  %1206 = vrot.lane.b32.xlu2 %v3130_v17, %s2044_s23  ;;  %v3603_v42 = vld [vmem:[#allocation43_spill] sm:$0xff] }
 0x211   : > { %1129 = vst.msk [vmem:[#allocation2 + $0x98] sm:$0xff] %vm1109_vm7, %v1052_v12  ;;  %v3604_v12 = vld [vmem:[#allocation41_spill] sm:$0xff] }
 0x212   : > { %v1074_v40 = vpop.permute.xlu2 %1073 }
 0x213   : > { %1140 = vst.msk [vmem:[#allocation2 + $0xf0] sm:$0xff] %vm1109_vm7, %v1074_v40 }
 0x215   : > { %1281 = vrot.lane.b32.xlu1 %v2151_v29, %s2045_s24 }
 0x216   : > { %1279 = vrot.lane.b32.xlu0 %v2126_v19, %s2045_s24 }
 0x217   : > { %v1060_v55 = vpop.permute.xlu1 %1059 }
 0x218   : > { %1133 = vst.msk [vmem:[#allocation2 + $0xb8] sm:$0xff] %vm1109_vm7, %v1060_v55  ;;  %v1058_v1 = vpop.permute.xlu0 %1057  ;;  %1283 = vrot.lane.b32.xlu2 %v2165_v33, %s2045_s24 }
 0x219   : > { %1132 = vst.msk [vmem:[#allocation2 + $0xb0] sm:$0xff] %vm1109_vm7, %v1058_v1  ;;  %v182_v1 = vld [vmem:[%s3432_s1] sm:$0xff] }
 0x21a   : > { %v1147_v0 = vpop.permute.xlu2 %1146 }
 0x21b   : > { %1242 = vst.msk [vmem:[#allocation2 + $0x8] sm:$0xff] %vm1240_vm8, %v1147_v0  ;;  %v3605_v0 = vld [vmem:[#allocation11_spill] sm:$0xff] }
 0x21d   : > { %1287 = vrot.lane.b32.xlu1 %v3554_v6, %s2045_s24  ;;  %v3589_v6 = vld [vmem:[#allocation15_spill] sm:$0xff] }
 0x21e   : > { %1285 = vrot.lane.b32.xlu0 %v2157_v31, %s2045_s24 }
 0x21f   : > { %v1066_v19 = vpop.permute.xlu1 %1065 }
 0x220   : > { %1136 = vst.msk [vmem:[#allocation2 + $0xd0] sm:$0xff] %vm1109_vm7, %v1066_v19  ;;  %v1064_v29 = vpop.permute.xlu0 %1063  ;;  %1289 = vrot.lane.b32.xlu2 %v3553_v57, %s2045_s24 }
 0x221   : > { %1135 = vst.msk [vmem:[#allocation2 + $0xc8] sm:$0xff] %vm1109_vm7, %v1064_v29  ;;  %v3606_v29 = vld [vmem:[#allocation33_spill] sm:$0xff] }
 0x222   : > { %v1153_v33 = vpop.permute.xlu2 %1152 }
 0x223   : > { %1245 = vst.msk [vmem:[#allocation2 + $0x20] sm:$0xff] %vm1240_vm8, %v1153_v33  ;;  %v3607_v33 = vld [vmem:[#allocation32_spill] sm:$0xff] }
 0x225   : > { %1445 = vrot.lane.b32.xlu1 %v3585_v45, %s2046_s25 }
 0x226   : > { %1311 = vrot.lane.b32.xlu0 %v3589_v6, %s2045_s24 }
 0x227   : > { %v1072_v31 = vpop.permute.xlu1 %1071 }
 0x228   : > { %1139 = vst.msk [vmem:[#allocation2 + $0xe8] sm:$0xff] %vm1109_vm7, %v1072_v31  ;;  %v1070_v63 = vpop.permute.xlu0 %1069  ;;  %1291 = vrot.lane.b32.xlu2 %v3590_v10, %s2045_s24 }
 0x229   : > { %1138 = vst.msk [vmem:[#allocation2 + $0xe0] sm:$0xff] %vm1109_vm7, %v1070_v63  ;;  %v3608_v63 = vld [vmem:[#allocation23_spill] sm:$0xff] }
 0x22a   : > { %v1159_v57 = vpop.permute.xlu2 %1158 }
 0x22b   : > { %1248 = vst.msk [vmem:[#allocation2 + $0x38] sm:$0xff] %vm1240_vm8, %v1159_v57  ;;  %v3609_v57 = vld [vmem:[#allocation42_spill] sm:$0xff] }
 0x22d   : > { %1313 = vrot.lane.b32.xlu1 %v3591_v13, %s2045_s24  ;;  %v3610_v13 = vld [vmem:[#allocation3_spill] sm:$0xff] }
 0x22e   : > { %1413 = vrot.lane.b32.xlu0 %v2480_v18, %s2046_s25 }
 0x22f   : > { %v1145_v45 = vpop.permute.xlu1 %1144 }
 0x230   : > { %1241 = vst.msk [vmem:[#allocation2] sm:$0xff] %vm1240_vm8, %v1145_v45  ;;  %v1076_v20 = vpop.permute.xlu0 %1075  ;;  %1447 = vrot.lane.b32.xlu2 %v3586_v23, %s2046_s25  ;;  %v3593_v23 = vld [vmem:[#allocation18_spill] sm:$0xff] }
 0x231   : > { %1141 = vst.msk [vmem:[#allocation2 + $0xf8] sm:$0xff] %vm1109_vm7, %v1076_v20 }
 0x232   : > { %v1165_v14 = vpop.permute.xlu2 %1164 }
 0x233   : > { %1251 = vst.msk [vmem:[#allocation2 + $0x50] sm:$0xff] %vm1240_vm8, %v1165_v14 }
 0x235   : > { %1315 = vrot.lane.b32.xlu1 %v3592_v22, %s2045_s24  ;;  %v3611_v22 = vld [vmem:[#allocation10_spill] sm:$0xff] }
 0x236   : > { %1415 = vrot.lane.b32.xlu0 %v3576_v9, %s2046_s25 }
 0x237   : > { %v1151_v25 = vpop.permute.xlu1 %1150 }
 0x238   : > { %1244 = vst.msk [vmem:[#allocation2 + $0x18] sm:$0xff] %vm1240_vm8, %v1151_v25  ;;  %v1149_v18 = vpop.permute.xlu0 %1148  ;;  %1449 = vrot.lane.b32.xlu2 %v2651_v16, %s2046_s25  ;;  %v3612_v25 = vld [vmem:[#allocation6_spill] sm:$0xff] }
 0x239   : > { %1243 = vst.msk [vmem:[#allocation2 + $0x10] sm:$0xff] %vm1240_vm8, %v1149_v18 }
 0x23a   : > { %v1171_v8 = vpop.permute.xlu2 %1170 }
 0x23b   : > { %1254 = vst.msk [vmem:[#allocation2 + $0x68] sm:$0xff] %vm1240_vm8, %v1171_v8 }
 0x23d   : > { %1317 = vrot.lane.b32.xlu1 %v3593_v23, %s2045_s24  ;;  %v3613_v23 = vld [vmem:[#allocation31_spill] sm:$0xff] }
 0x23e   : > { %1417 = vrot.lane.b32.xlu0 %v3578_v47, %s2046_s25 }
 0x23f   : > { %v1157_v30 = vpop.permute.xlu1 %1156 }
 0x240   : > { %1247 = vst.msk [vmem:[#allocation2 + $0x30] sm:$0xff] %vm1240_vm8, %v1157_v30  ;;  %v1155_v9 = vpop.permute.xlu0 %1154  ;;  %1327 = vrot.lane.b32.xlu2 %v3594_v32, %s2045_s24  ;;  %v3614_v32 = vld [vmem:[#allocation5_spill] sm:$0xff] }
 0x241   : > { %1246 = vst.msk [vmem:[#allocation2 + $0x28] sm:$0xff] %vm1240_vm8, %v1155_v9  ;;  %v1409_v9 = vrot.slane %v3130_v17, 2 }
 0x242   : > { %v1177_v34 = vpop.permute.xlu2 %1176 }
 0x243   : > { %1257 = vst.msk [vmem:[#allocation2 + $0x80] sm:$0xff] %vm1240_vm8, %v1177_v34  ;;  %v3615_v34 = vld [vmem:[#allocation35_spill] sm:$0xff] }
 0x245   : > { %1461 = vrot.lane.b32.xlu1 %v2696_v27, %s2046_s25 }
 0x246   : > { %1451 = vrot.lane.b32.xlu0 %v3587_v50, %s2046_s25 }
 0x247   : > { %v1163_v16 = vpop.permute.xlu1 %1162 }
 0x248   : > { %1250 = vst.msk [vmem:[#allocation2 + $0x48] sm:$0xff] %vm1240_vm8, %v1163_v16  ;;  %v1161_v47 = vpop.permute.xlu0 %1160  ;;  %1295 = vrot.lane.b32.xlu2 %v3595_v35, %s2045_s24 }
 0x249   : > { %1249 = vst.msk [vmem:[#allocation2 + $0x40] sm:$0xff] %vm1240_vm8, %v1161_v47 }
 0x24a   : > { %v1183_v46 = vpop.permute.xlu2 %1182 }
 0x24b   : > { %1260 = vst.msk [vmem:[#allocation2 + $0x98] sm:$0xff] %vm1240_vm8, %v1183_v46 }
 0x24d   : > { %1429 = vrot.lane.b32.xlu1 %v2572_v5, %s2046_s25 }
 0x24e   : > { %1419 = vrot.lane.b32.xlu0 %v3577_v4, %s2046_s25 }
 0x24f   : > { %v1169_v27 = vpop.permute.xlu1 %1168 }
 0x250   : > { %1253 = vst.msk [vmem:[#allocation2 + $0x60] sm:$0xff] %vm1240_vm8, %v1169_v27  ;;  %v1167_v50 = vpop.permute.xlu0 %1166  ;;  %1319 = vrot.lane.b32.xlu2 %v3596_v49, %s2045_s24  ;;  %v3617_v49 = vld [vmem:[#allocation12_spill] sm:$0xff] }
 0x251   : > { %1252 = vst.msk [vmem:[#allocation2 + $0x58] sm:$0xff] %vm1240_vm8, %v1167_v50  ;;  %v3616_v50 = vld [vmem:[#allocation34_spill] sm:$0xff] }
 0x252   : > { %v1189_v54 = vpop.permute.xlu2 %1188 }
 0x253   : > { %1263 = vst.msk [vmem:[#allocation2 + $0xb0] sm:$0xff] %vm1240_vm8, %v1189_v54 }
 0x255   : > { %1453 = vrot.lane.b32.xlu1 %v2664_v61, %s2046_s25  ;;  %v3597_v61 = vld [vmem:[#allocation7_spill] sm:$0xff] }
 0x256   : > { %1329 = vrot.lane.b32.xlu0 %v2415_v60, %s2045_s24 }
 0x257   : > { %v1175_v5 = vpop.permute.xlu1 %1174 }
 0x258   : > { %1256 = vst.msk [vmem:[#allocation2 + $0x78] sm:$0xff] %vm1240_vm8, %v1175_v5  ;;  %v1173_v4 = vpop.permute.xlu0 %1172  ;;  %1463 = vrot.lane.b32.xlu2 %v2691_v7, %s2046_s25  ;;  %v3598_v7 = vld [vmem:[#allocation25_spill] sm:$0xff] }
 0x259   : > { %1255 = vst.msk [vmem:[#allocation2 + $0x70] sm:$0xff] %vm1240_vm8, %v1173_v4 }
 0x25a   : > { %v1195_v56 = vpop.permute.xlu2 %1194 }
 0x25b   : > { %1266 = vst.msk [vmem:[#allocation2 + $0xc8] sm:$0xff] %vm1240_vm8, %v1195_v56 }
 0x25d   : > { %1421 = vrot.lane.b32.xlu1 %v3579_v53, %s2046_s25  ;;  %v3599_v53 = vld [vmem:[#allocation19_spill] sm:$0xff] }
 0x25e   : > { %1297 = vrot.lane.b32.xlu0 %v3597_v61, %s2045_s24  ;;  %v240_v61 = vld [vmem:[%s2081_s17 + $0x1a8] sm:$0x3] }
 0x25f   : > { %v1181_v58 = vpop.permute.xlu1 %1180 }
 0x260   : > { %1259 = vst.msk [vmem:[#allocation2 + $0x90] sm:$0xff] %vm1240_vm8, %v1181_v58  ;;  %v1179_v60 = vpop.permute.xlu0 %1178  ;;  %1431 = vrot.lane.b32.xlu2 %v2583_v52, %s2046_s25  ;;  %v3600_v52 = vld [vmem:[#allocation9_spill] sm:$0xff]  ;;  %v3618_v58 = vld [vmem:[#allocation14_spill] sm:$0xff] }
 0x261   : > { %1258 = vst.msk [vmem:[#allocation2 + $0x88] sm:$0xff] %vm1240_vm8, %v1179_v60  ;;  %v1275_v60 = vrot.slane %v3130_v17, 1 }
 0x262   : > { %v1201_v59 = vpop.permute.xlu2 %1200 }
 0x263   : > { %1269 = vst.msk [vmem:[#allocation2 + $0xe0] sm:$0xff] %vm1240_vm8, %v1201_v59 }
 0x265   : > { %1331 = vrot.lane.b32.xlu1 %v3598_v7, %s2045_s24  ;;  %v1277_v7 = vrot.slane %v240_v61, 1 }
 0x266   : > { %1321 = vrot.lane.b32.xlu0 %v3599_v53, %s2045_s24 }
 0x267   : > { %v1187_v15 = vpop.permute.xlu1 %1186 }
 0x268   : > { %1262 = vst.msk [vmem:[#allocation2 + $0xa8] sm:$0xff] %vm1240_vm8, %v1187_v15  ;;  %v1185_v21 = vpop.permute.xlu0 %1184  ;;  %1455 = vrot.lane.b32.xlu2 %v2674_v44, %s2046_s25 }
 0x269   : > { %1261 = vst.msk [vmem:[#allocation2 + $0xa0] sm:$0xff] %vm1240_vm8, %v1185_v21 }
 0x26a   : > { %v1207_v36 = vpop.permute.xlu2 %1206 }
 0x26b   : > { %1272 = vst.msk [vmem:[#allocation2 + $0xf8] sm:$0xff] %vm1240_vm8, %v1207_v36  ;;  %v1278_v36 = vsel %vm322_vm0, %v1275_v60, %v1277_v7 }
 0x26d   : > { %1299 = vrot.lane.b32.xlu1 %v3600_v52, %s2045_s24 }
 0x26e   : > { %1465 = vrot.lane.b32.xlu0 %v2707_v2, %s2046_s25 }
 0x26f   : > { %v1193_v39 = vpop.permute.xlu1 %1192 }
 0x270   : > { %1265 = vst.msk [vmem:[#allocation2 + $0xc0] sm:$0xff] %vm1240_vm8, %v1193_v39  ;;  %v1191_v41 = vpop.permute.xlu0 %1190  ;;  %1423 = vrot.lane.b32.xlu2 %v3581_v3, %s2046_s25  ;;  %v3602_v3 = vld [vmem:[#allocation24_spill] sm:$0xff]  ;;  %v1274_v39 = vrot.slane %v3120_v26, 1 }
 0x271   : > { %1264 = vst.msk [vmem:[#allocation2 + $0xb8] sm:$0xff] %vm1240_vm8, %v1191_v41 }
 0x272   : > { %v1284_v44 = vpop.permute.xlu2 %1283 }
 0x273   : > { %1378 = vst.msk [vmem:[#allocation2 + $0x10] sm:$0xff] %vm1375_vm9, %v1284_v44 }
 0x275   : > { %1323 = vrot.lane.b32.xlu1 %v3601_v38, %s2045_s24  ;;  %v1411_v38 = vrot.slane %v240_v61, 2 }
 0x276   : > { %1433 = vrot.lane.b32.xlu0 %v2577_v43, %s2046_s25  ;;  %v185_v43 = vld [vmem:[%s3432_s1 + $0x18] sm:$0xff] }
 0x277   : > { %v1199_v2 = vpop.permute.xlu1 %1198  ;;  %2003 = vmatpush.msra.mxu2 %v185_v43  ;;  %1687 = vmatpush.msra.mxu0 %v185_v43 }
 0x278   : > { %1268 = vst.msk [vmem:[#allocation2 + $0xd8] sm:$0xff] %vm1240_vm8, %v1199_v2  ;;  %v1197_v48 = vpop.permute.xlu0 %1196  ;;  %1333 = vrot.lane.b32.xlu2 %v3602_v3, %s2045_s24  ;;  %2004 = vmatpush.msra.mxu3 %v185_v43  ;;  %v1276_v2 = vsel %vm322_vm0, %v1274_v39, %v1275_v60 }
 0x279   : > { %1267 = vst.msk [vmem:[#allocation2 + $0xd0] sm:$0xff] %vm1240_vm8, %v1197_v48  ;;  %2006 = vmatpush.msra.mxu2 %v184_v11  ;;  %1688 = vmatpush.msra.mxu0 %v184_v11  ;;  %v1412_v48 = vsel %vm532_vm1, %v1409_v9, %v1411_v38 }
 0x27a   : > { %v1290_v24 = vpop.permute.xlu2 %1289  ;;  %2007 = vmatpush.msra.mxu3 %v184_v11  ;;  %2002 = vmatpush.msra.mxu1 %v185_v43 }
 0x27b   : > { %1381 = vst.msk [vmem:[#allocation2 + $0x28] sm:$0xff] %vm1375_vm9, %v1290_v24  ;;  %2009 = vmatpush.msra.mxu2 %v183_v62  ;;  %1689 = vmatpush.msra.mxu0 %v183_v62 }
 0x27c   : > { %2010 = vmatpush.msra.mxu3 %v183_v62  ;;  %2005 = vmatpush.msra.mxu1 %v184_v11 }
 0x27d   : > { %1467 = vrot.lane.b32.xlu1 %v3603_v42, %s2046_s25  ;;  %2012 = vmatpush.msra.mxu2 %v182_v1 }
 0x27e   : > { %1457 = vrot.lane.b32.xlu0 %v3604_v12, %s2046_s25  ;;  %1690 = vmatpush.msra.mxu0 %v182_v1 }
 0x27f   : > { %v1205_v40 = vpop.permute.xlu1 %1204  ;;  %2013 = vmatpush.msra.mxu3 %v182_v1  ;;  %2008 = vmatpush.msra.mxu1 %v183_v62  ;;  %v3620_v62 = vld [vmem:[#allocation36_spill] sm:$0xff] }
 0x280   : > { %1271 = vst.msk [vmem:[#allocation2 + $0xf0] sm:$0xff] %vm1240_vm8, %v1205_v40  ;;  %v1203_v55 = vpop.permute.xlu0 %1202  ;;  %1301 = vrot.lane.b32.xlu2 %v3605_v0, %s2045_s24  ;;  %v3621_v0 = vld [vmem:[#allocation13_spill] sm:$0xff] }
 0x281   : > { %1270 = vst.msk [vmem:[#allocation2 + $0xe8] sm:$0xff] %vm1240_vm8, %v1203_v55  ;;  %2011 = vmatpush.msra.mxu1 %v182_v1 }
 0x282   : > { %v1292_v19 = vpop.permute.xlu2 %1291 }
 0x283   : > { %1382 = vst.msk [vmem:[#allocation2 + $0x30] sm:$0xff] %vm1375_vm9, %v1292_v19 }
 0x285   : > { %1435 = vrot.lane.b32.xlu1 %v3606_v29, %s2046_s25 }
 0x286   : > { %1425 = vrot.lane.b32.xlu0 %v3607_v33, %s2046_s25 }
 0x287   : > { %v1282_v6 = vpop.permute.xlu1 %1281 }
 0x288   : > { %1377 = vst.msk [vmem:[#allocation2 + $0x8] sm:$0xff] %vm1375_vm9, %v1282_v6  ;;  %v1280_v31 = vpop.permute.xlu0 %1279  ;;  %1325 = vrot.lane.b32.xlu2 %v3608_v63, %s2045_s24 }
 0x289   : > { %1376 = vst.msk [vmem:[#allocation2] sm:$0xff] %vm1375_vm9, %v1280_v31 }
 0x28a   : > { %v1448_v10 = vpop.permute.xlu2 %1447 }
 0x28d   : > { %1459 = vrot.lane.b32.xlu1 %v3609_v57, %s2046_s25 }
 0x28e   : > { %1335 = vrot.lane.b32.xlu0 %v3610_v13, %s2045_s24 }
 0x28f   : > { %v1288_v45 = vpop.permute.xlu1 %1287 }
 0x290   : > { %1380 = vst.msk [vmem:[#allocation2 + $0x20] sm:$0xff] %vm1375_vm9, %v1288_v45  ;;  %v1286_v20 = vpop.permute.xlu0 %1285  ;;  %1469 = vrot.lane.b32.xlu2 %v3022_v37, %s2046_s25  ;;  %v1408_v37 = vrot.slane %v3120_v26, 2  ;;  %v3619_v26 = vld [vmem:[#allocation38_spill] sm:$0xff] }
 0x291   : > { %1379 = vst.msk [vmem:[#allocation2 + $0x18] sm:$0xff] %vm1375_vm9, %v1286_v20 }
 0x292   : > { %v1450_v14 = vpop.permute.xlu2 %1449  ;;  %v1410_v46 = vsel %vm532_vm1, %v1408_v37, %v1409_v9 }
 0x295   : > { %1303 = vrot.lane.b32.xlu1 %v3611_v22, %s2045_s24 }
 0x296   : > { %1293 = vrot.lane.b32.xlu0 %v3612_v25, %s2045_s24 }
 0x297   : > { %v1446_v18 = vpop.permute.xlu1 %1445 }
 0x298   : > { %v1312_v8 = vpop.permute.xlu0 %1311  ;;  %1427 = vrot.lane.b32.xlu2 %v3613_v23, %s2046_s25 }
 0x299   : > { %1392 = vst.msk [vmem:[#allocation2 + $0x80] sm:$0xff] %vm1375_vm9, %v1312_v8 }
 0x29a   : > { %1526 = vst.msk [vmem:[#allocation2 + $0x80] sm:$0xff] %vm1509_vm11, %v1446_v18  ;;  %v1328_v30 = vpop.permute.xlu2 %1327 }
 0x29b   : > { %1400 = vst.msk [vmem:[#allocation2 + $0xc0] sm:$0xff] %vm1375_vm9, %v1328_v30 }
 0x29d   : > { %1337 = vrot.lane.b32.xlu1 %v3614_v32, %s2045_s24 }
 0x29e   : > { %1437 = vrot.lane.b32.xlu0 %v3615_v34, %s2046_s25 }
 0x29f   : > { %v1314_v16 = vpop.permute.xlu1 %1313 }
 0x2a0   : > { %1393 = vst.msk [vmem:[#allocation2 + $0x88] sm:$0xff] %vm1375_vm9, %v1314_v16  ;;  %v1414_v47 = vpop.permute.xlu0 %1413  ;;  %1471 = vrot.lane.b32.xlu2 %v3029_v51, %s2046_s25 }
 0x2a1   : > { %1510 = vst.msk [vmem:[#allocation2] sm:$0xff] %vm1509_vm11, %v1414_v47  ;;  %v1558_v35 = vld [vmem:[#allocation2 + $0x80] sm:$0xff] }
 0x2a2   : > { %1527 = vst.msk [vmem:[#allocation2 + $0x88] sm:$0xff] %vm1509_vm11, %v1448_v10  ;;  %1980 = vmatmul.msk.f32.vlgmr.msra.gmra.mxu2 %vm1574_vm12, %v1558_v35  ;;  %v1296_v27 = vpop.permute.xlu2 %1295 }
 0x2a3   : > { %1384 = vst.msk [vmem:[#allocation2 + $0x40] sm:$0xff] %vm1375_vm9, %v1296_v27 }
 0x2a5   : > { %1439 = vrot.lane.b32.xlu1 %v3616_v50, %s2046_s25 }
 0x2a6   : > { %1305 = vrot.lane.b32.xlu0 %v3617_v49, %s2045_s24 }
 0x2a7   : > { %v1316_v54 = vpop.permute.xlu1 %1315 }
 0x2a8   : > { %1394 = vst.msk [vmem:[#allocation2 + $0x90] sm:$0xff] %vm1375_vm9, %v1316_v54  ;;  %v1416_v5 = vpop.permute.xlu0 %1415  ;;  %v1542_v4 = vld [vmem:[#allocation2] sm:$0xff]  ;;  %1339 = vrot.lane.b32.xlu2 %v1276_v2, %s2045_s24 }
 0x2a9   : > { %1511 = vst.msk [vmem:[#allocation2 + $0x8] sm:$0xff] %vm1509_vm11, %v1416_v5  ;;  %1964 = vmatmul.msk.f32.vlgmr.msra.gmra.mxu0 %vm1574_vm12, %v1542_v4  ;;  %v1559_v56 = vld [vmem:[#allocation2 + $0x88] sm:$0xff] }
 0x2aa   : > { %1528 = vst.msk [vmem:[#allocation2 + $0x90] sm:$0xff] %vm1509_vm11, %v1450_v14  ;;  %1981 = vmatmul.msk.f32.gmra.mxu2 %vm1574_vm12, %v1559_v56  ;;  %v1320_v51 = vpop.permute.xlu2 %1319 }
 0x2ab   : > { %1396 = vst.msk [vmem:[#allocation2 + $0xa0] sm:$0xff] %vm1375_vm9, %v1320_v51 }
 0x2ad   : > { %1307 = vrot.lane.b32.xlu1 %v3618_v58, %s2045_s24 }
 0x2ae   : > { %1473 = vrot.lane.b32.xlu0 %v1410_v46, %s2046_s25 }
 0x2af   : > { %v1318_v59 = vpop.permute.xlu1 %1317 }
 0x2b0   : > { %1395 = vst.msk [vmem:[#allocation2 + $0x98] sm:$0xff] %vm1375_vm9, %v1318_v59  ;;  %v1418_v53 = vpop.permute.xlu0 %1417  ;;  %v1543_v15 = vld [vmem:[#allocation2 + $0x8] sm:$0xff]  ;;  %1441 = vrot.lane.b32.xlu2 %v3620_v62, %s2046_s25 }
 0x2b1   : > { %1512 = vst.msk [vmem:[#allocation2 + $0x10] sm:$0xff] %vm1509_vm11, %v1418_v53  ;;  %1965 = vmatmul.msk.f32.gmra.mxu0 %vm1574_vm12, %v1543_v15  ;;  %v1560_v21 = vld [vmem:[#allocation2 + $0x90] sm:$0xff] }
 0x2b2   : > { %1982 = vmatmul.msk.f32.gmra.mxu2 %vm1574_vm12, %v1560_v21  ;;  %v1464_v52 = vpop.permute.xlu2 %1463 }
 0x2b5   : > { %1475 = vrot.lane.b32.xlu1 %v1412_v48, %s2046_s25 }
 0x2b6   : > { %1341 = vrot.lane.b32.xlu0 %v1278_v36, %s2045_s24 }
 0x2b7   : > { %v1462_v17 = vpop.permute.xlu1 %1461 }
 0x2b8   : > { %1534 = vst.msk [vmem:[#allocation2 + $0xc0] sm:$0xff] %vm1509_vm11, %v1462_v17  ;;  %v1452_v41 = vpop.permute.xlu0 %1451  ;;  %v1544_v44 = vld [vmem:[#allocation2 + $0x10] sm:$0xff]  ;;  %1309 = vrot.lane.b32.xlu2 %v3621_v0, %s2045_s24 }
 0x2b9   : > { %1529 = vst.msk [vmem:[#allocation2 + $0x98] sm:$0xff] %vm1509_vm11, %v1452_v41  ;;  %1966 = vmatmul.msk.f32.gmra.mxu0 %vm1574_vm12, %v1544_v44 }
 0x2ba   : > { %v1432_v28 = vpop.permute.xlu2 %1431 }
 0x2be   : > { %1443 = vrot.lane.b32.xlu0 %v3619_v26, %s2046_s25 }
 0x2bf   : > { %v1430_v3 = vpop.permute.xlu1 %1429  ;;  %v1566_v43 = vld [vmem:[#allocation2 + $0xc0] sm:$0xff] }
 0x2c0   : > { %1518 = vst.msk [vmem:[#allocation2 + $0x40] sm:$0xff] %vm1509_vm11, %v1430_v3  ;;  %v1420_v11 = vpop.permute.xlu0 %1419  ;;  %v1561_v24 = vld [vmem:[#allocation2 + $0x98] sm:$0xff]  ;;  %1988 = vmatmul.msk.f32.vlgmr.msra.gmra.mxu3 %vm1574_vm12, %v1566_v43 }
 0x2c1   : > { %1513 = vst.msk [vmem:[#allocation2 + $0x18] sm:$0xff] %vm1509_vm11, %v1420_v11  ;;  %1983 = vmatmul.msk.f32.gmra.mxu2 %vm1574_vm12, %v1561_v24 }
 0x2c2   : > { %v1456_v42 = vpop.permute.xlu2 %1455 }
 0x2c7   : > { %v1454_v12 = vpop.permute.xlu1 %1453  ;;  %v1550_v40 = vld [vmem:[#allocation2 + $0x40] sm:$0xff] }
 0x2c8   : > { %1530 = vst.msk [vmem:[#allocation2 + $0xa0] sm:$0xff] %vm1509_vm11, %v1454_v12  ;;  %v1330_v55 = vpop.permute.xlu0 %1329  ;;  %v1545_v1 = vld [vmem:[#allocation2 + $0x18] sm:$0xff]  ;;  %1972 = vmatmul.msk.f32.vlgmr.msra.gmra.mxu1 %vm1574_vm12, %v1550_v40 }
 0x2c9   : > { %1401 = vst.msk [vmem:[#allocation2 + $0xc8] sm:$0xff] %vm1375_vm9, %v1330_v55  ;;  %1967 = vmatmul.msk.f32.gmra.mxu0 %vm1574_vm12, %v1545_v1 }
 0x2ca   : > { %1535 = vst.msk [vmem:[#allocation2 + $0xc8] sm:$0xff] %vm1509_vm11, %v1464_v52  ;;  %v1424_v19 = vpop.permute.xlu2 %1423 }
 0x2cb   : > { %1515 = vst.msk [vmem:[#allocation2 + $0x28] sm:$0xff] %vm1509_vm11, %v1424_v19 }
 0x2cf   : > { %v1422_v29 = vpop.permute.xlu1 %1421  ;;  %v1562_v33 = vld [vmem:[#allocation2 + $0xa0] sm:$0xff] }
 0x2d0   : > { %1514 = vst.msk [vmem:[#allocation2 + $0x20] sm:$0xff] %vm1509_vm11, %v1422_v29  ;;  %v1298_v6 = vpop.permute.xlu0 %1297  ;;  %1984 = vmatmul.msk.f32.gmra.mxu2 %vm1574_vm12, %v1562_v33 }
 0x2d1   : > { %1385 = vst.msk [vmem:[#allocation2 + $0x48] sm:$0xff] %vm1375_vm9, %v1298_v6  ;;  %v1567_v31 = vld [vmem:[#allocation2 + $0xc8] sm:$0xff] }
 0x2d2   : > { %1519 = vst.msk [vmem:[#allocation2 + $0x48] sm:$0xff] %vm1509_vm11, %v1432_v28  ;;  %1989 = vmatmul.msk.f32.gmra.mxu3 %vm1574_vm12, %v1567_v31  ;;  %v1334_v63 = vpop.permute.xlu2 %1333  ;;  %v1547_v14 = vld [vmem:[#allocation2 + $0x28] sm:$0xff] }
 0x2d3   : > { %1403 = vst.msk [vmem:[#allocation2 + $0xd8] sm:$0xff] %vm1375_vm9, %v1334_v63 }
 0x2d7   : > { %v1332_v10 = vpop.permute.xlu1 %1331  ;;  %v1546_v57 = vld [vmem:[#allocation2 + $0x20] sm:$0xff] }
 0x2d8   : > { %1402 = vst.msk [vmem:[#allocation2 + $0xd0] sm:$0xff] %vm1375_vm9, %v1332_v10  ;;  %v1322_v13 = vpop.permute.xlu0 %1321  ;;  %1968 = vmatmul.msk.f32.gmra.mxu0 %vm1574_vm12, %v1546_v57 }
 0x2d9   : > { %1397 = vst.msk [vmem:[#allocation2 + $0xa8] sm:$0xff] %vm1375_vm9, %v1322_v13  ;;  %v1551_v45 = vld [vmem:[#allocation2 + $0x48] sm:$0xff] }
 0x2da   : > { %1531 = vst.msk [vmem:[#allocation2 + $0xa8] sm:$0xff] %vm1509_vm11, %v1456_v42  ;;  %1973 = vmatmul.msk.f32.gmra.mxu1 %vm1574_vm12, %v1551_v45  ;;  %v1302_v20 = vpop.permute.xlu2 %1301 }
 0x2db   : > { %1387 = vst.msk [vmem:[#allocation2 + $0x58] sm:$0xff] %vm1375_vm9, %v1302_v20 }
 0x2df   : > { %v1300_v22 = vpop.permute.xlu1 %1299 }
 0x2e0   : > { %1386 = vst.msk [vmem:[#allocation2 + $0x50] sm:$0xff] %vm1375_vm9, %v1300_v22  ;;  %v1466_v25 = vpop.permute.xlu0 %1465  ;;  %1969 = vmatmul.msk.f32.gmra.mxu0 %vm1574_vm12, %v1547_v14 }
 0x2e1   : > { %1536 = vst.msk [vmem:[#allocation2 + $0xd0] sm:$0xff] %vm1509_vm11, %v1466_v25  ;;  %v1563_v18 = vld [vmem:[#allocation2 + $0xa8] sm:$0xff] }
 0x2e2   : > { %1985 = vmatmul.msk.f32.gmra.mxu2 %vm1574_vm12, %v1563_v18  ;;  %v1326_v8 = vpop.permute.xlu2 %1325 }
 0x2e3   : > { %1399 = vst.msk [vmem:[#allocation2 + $0xb8] sm:$0xff] %vm1375_vm9, %v1326_v8 }
 0x2e7   : > { %v1324_v23 = vpop.permute.xlu1 %1323 }
 0x2e8   : > { %1398 = vst.msk [vmem:[#allocation2 + $0xb0] sm:$0xff] %vm1375_vm9, %v1324_v23  ;;  %v1434_v30 = vpop.permute.xlu0 %1433  ;;  %v1568_v37 = vld [vmem:[#allocation2 + $0xd0] sm:$0xff] }
 0x2e9   : > { %1520 = vst.msk [vmem:[#allocation2 + $0x50] sm:$0xff] %vm1509_vm11, %v1434_v30  ;;  %1990 = vmatmul.msk.f32.gmra.mxu3 %vm1574_vm12, %v1568_v37 }
 0x2ea   : > { %v1470_v27 = vpop.permute.xlu2 %1469 }
 0x2ef   : > { %v1468_v9 = vpop.permute.xlu1 %1467 }
 0x2f0   : > { %1537 = vst.msk [vmem:[#allocation2 + $0xd8] sm:$0xff] %vm1509_vm11, %v1468_v9  ;;  %v1458_v32 = vpop.permute.xlu0 %1457  ;;  %v1552_v34 = vld [vmem:[#allocation2 + $0x50] sm:$0xff] }
 0x2f1   : > { %1532 = vst.msk [vmem:[#allocation2 + $0xb0] sm:$0xff] %vm1509_vm11, %v1458_v32  ;;  %1974 = vmatmul.msk.f32.gmra.mxu1 %vm1574_vm12, %v1552_v34 }
 0x2f2   : > { %v1428_v4 = vpop.permute.xlu2 %1427 }
 0x2f7   : > { %v1436_v16 = vpop.permute.xlu1 %1435  ;;  %v1569_v47 = vld [vmem:[#allocation2 + $0xd8] sm:$0xff] }
 0x2f8   : > { %1521 = vst.msk [vmem:[#allocation2 + $0x58] sm:$0xff] %vm1509_vm11, %v1436_v16  ;;  %v1426_v35 = vpop.permute.xlu0 %1425  ;;  %v1564_v46 = vld [vmem:[#allocation2 + $0xb0] sm:$0xff]  ;;  %1991 = vmatmul.msk.f32.gmra.mxu3 %vm1574_vm12, %v1569_v47 }
 0x2f9   : > { %1516 = vst.msk [vmem:[#allocation2 + $0x30] sm:$0xff] %vm1509_vm11, %v1426_v35  ;;  %1986 = vmatmul.msk.f32.gmra.mxu2 %vm1574_vm12, %v1564_v46 }
 0x2fa   : > { %v1472_v59 = vpop.permute.xlu2 %1471 }
 0x2ff   : > { %v1460_v50 = vpop.permute.xlu1 %1459  ;;  %v1553_v49 = vld [vmem:[#allocation2 + $0x58] sm:$0xff] }
 0x300   : > { %1533 = vst.msk [vmem:[#allocation2 + $0xb8] sm:$0xff] %vm1509_vm11, %v1460_v50  ;;  %v1336_v54 = vpop.permute.xlu0 %1335  ;;  %v1548_v5 = vld [vmem:[#allocation2 + $0x30] sm:$0xff]  ;;  %1975 = vmatmul.msk.f32.gmra.mxu1 %vm1574_vm12, %v1553_v49 }
 0x301   : > { %1404 = vst.msk [vmem:[#allocation2 + $0xe0] sm:$0xff] %vm1375_vm9, %v1336_v54  ;;  %1970 = vmatmul.msk.f32.gmra.mxu0 %vm1574_vm12, %v1548_v5 }
 0x302   : > { %1538 = vst.msk [vmem:[#allocation2 + $0xe0] sm:$0xff] %vm1509_vm11, %v1470_v27  ;;  %v1340_v21 = vpop.permute.xlu2 %1339 }
 0x303   : > { %1406 = vst.msk [vmem:[#allocation2 + $0xf0] sm:$0xff] %vm1375_vm9, %v1340_v21 }
 0x307   : > { %v1565_v56 = vld [vmem:[#allocation2 + $0xb8] sm:$0xff]  ;;  %v1304_v51 = vpop.permute.xlu1 %1303 }
 0x308   : > { %v1294_v61 = vpop.permute.xlu0 %1293  ;;  %1987 = vmatmul.msk.f32.gmra.mxu2 %vm1574_vm12, %v1565_v56  ;;  %1388 = vst.msk [vmem:[#allocation2 + $0x60] sm:$0xff] %vm1375_vm9, %v1304_v51 }
 0x309   : > { %1383 = vst.msk [vmem:[#allocation2 + $0x38] sm:$0xff] %vm1375_vm9, %v1294_v61  ;;  %v1570_v58 = vld [vmem:[#allocation2 + $0xe0] sm:$0xff] }
 0x30a   : > { %1517 = vst.msk [vmem:[#allocation2 + $0x38] sm:$0xff] %vm1509_vm11, %v1428_v4  ;;  %1992 = vmatmul.msk.f32.gmra.mxu3 %vm1574_vm12, %v1570_v58  ;;  %v1442_v41 = vpop.permute.xlu2 %1441 }
 0x30f   : > { %v1338_v60 = vpop.permute.xlu1 %1337 }
 0x310   : > { %v1438_v7 = vpop.permute.xlu0 %1437  ;;  %1405 = vst.msk [vmem:[#allocation2 + $0xe8] sm:$0xff] %vm1375_vm9, %v1338_v60 }
 0x311   : > { %v1549_v53 = vld [vmem:[#allocation2 + $0x38] sm:$0xff]  ;;  %1522 = vst.msk [vmem:[#allocation2 + $0x60] sm:$0xff] %vm1509_vm11, %v1438_v7 }
 0x312   : > { %1971 = vmatmul.msk.f32.gmra.mxu0 %vm1574_vm12, %v1549_v53  ;;  %1539 = vst.msk [vmem:[#allocation2 + $0xe8] sm:$0xff] %vm1509_vm11, %v1472_v59  ;;  %v1310_v28 = vpop.permute.xlu2 %1309 }
 0x313   : > { %1391 = vst.msk [vmem:[#allocation2 + $0x78] sm:$0xff] %vm1375_vm9, %v1310_v28 }
 0x317   : > { %v1440_v15 = vpop.permute.xlu1 %1439 }
 0x318   : > { %v1306_v36 = vpop.permute.xlu0 %1305  ;;  %v1554_v52 = vld [vmem:[#allocation2 + $0x60] sm:$0xff] }
 0x319   : > { %1389 = vst.msk [vmem:[#allocation2 + $0x68] sm:$0xff] %vm1375_vm9, %v1306_v36  ;;  %1976 = vmatmul.msk.f32.gmra.mxu1 %vm1574_vm12, %v1554_v52  ;;  %v1571_v39 = vld [vmem:[#allocation2 + $0xe8] sm:$0xff] }
 0x31a   : > { %1523 = vst.msk [vmem:[#allocation2 + $0x68] sm:$0xff] %vm1509_vm11, %v1440_v15  ;;  %1993 = vmatmul.msk.f32.gmra.mxu3 %vm1574_vm12, %v1571_v39 }
 0x31f   : > { %v1308_v17 = vpop.permute.xlu1 %1307 }
 0x320   : > { %v1474_v44 = vpop.permute.xlu0 %1473  ;;  %1390 = vst.msk [vmem:[#allocation2 + $0x70] sm:$0xff] %vm1375_vm9, %v1308_v17 }
 0x321   : > { %1540 = vst.msk [vmem:[#allocation2 + $0xf0] sm:$0xff] %vm1509_vm11, %v1474_v44  ;;  %v1555_v38 = vld [vmem:[#allocation2 + $0x68] sm:$0xff] }
 0x322   : > { %1524 = vst.msk [vmem:[#allocation2 + $0x70] sm:$0xff] %vm1509_vm11, %v1442_v41  ;;  %1977 = vmatmul.msk.f32.gmra.mxu1 %vm1574_vm12, %v1555_v38 }
 0x325   : > { %v1740_v2 = vpop.f32.mrf.mxu2 }
 0x326   : > { %1820 = vxpose.xlu2.b32.start [1/16] (narrow) %v1740_v2, 8  ;;  %v1692_v48 = vpop.f32.mrf.mxu0 }
 0x327   : > { %1788 = vxpose.xlu1.b32.start [1/16] (narrow) %v1692_v48, 8  ;;  %v1476_v62 = vpop.permute.xlu1 %1475 }
 0x328   : > { %v1342_v26 = vpop.permute.xlu0 %1341  ;;  %v1572_v3 = vld [vmem:[#allocation2 + $0xf0] sm:$0xff] }
 0x329   : > { %1407 = vst.msk [vmem:[#allocation2 + $0xf8] sm:$0xff] %vm1375_vm9, %v1342_v26  ;;  %1994 = vmatmul.msk.f32.gmra.mxu3 %vm1574_vm12, %v1572_v3  ;;  %v1556_v43 = vld [vmem:[#allocation2 + $0x70] sm:$0xff] }
 0x32a   : > { %1978 = vmatmul.msk.f32.gmra.mxu1 %vm1574_vm12, %v1556_v43  ;;  %1541 = vst.msk [vmem:[#allocation2 + $0xf8] sm:$0xff] %vm1509_vm11, %v1476_v62 }
 0x32d   : > { %v1743_v11 = vpop.f32.mrf.mxu2 }
 0x32e   : > { %1821 = vxpose.xlu2.b32.cont [2/16] (narrow) %v1743_v11, 8  ;;  %v1695_v24 = vpop.f32.mrf.mxu0 }
 0x32f   : > { %1789 = vxpose.xlu1.b32.cont [2/16] (narrow) %v1695_v24, 8 }
 0x330   : > { %v1444_v42 = vpop.permute.xlu0 %1443 }
 0x331   : > { %1525 = vst.msk [vmem:[#allocation2 + $0x78] sm:$0xff] %vm1509_vm11, %v1444_v42  ;;  %v1573_v55 = vld [vmem:[#allocation2 + $0xf8] sm:$0xff] }
 0x332   : > { %1995 = vmatmul.msk.f32.gmra.mxu3 %vm1574_vm12, %v1573_v55 }
 0x335   : > { %v1746_v12 = vpop.f32.mrf.mxu2 }
 0x336   : > { %1822 = vxpose.xlu2.b32.cont [3/16] (narrow) %v1746_v12, 8  ;;  %v1698_v40 = vpop.f32.mrf.mxu0 }
 0x337   : > { %1790 = vxpose.xlu1.b32.cont [3/16] (narrow) %v1698_v40, 8 }
 0x338   : > { %v1557_v1 = vld [vmem:[#allocation2 + $0x78] sm:$0xff] }
 0x339   : > { %1979 = vmatmul.msk.f32.gmra.mxu1 %vm1574_vm12, %v1557_v1 }
 0x343   : > { %v1764_v57 = vpop.f32.mrf.mxu3 }
 0x344   : > { %v1749_v0 = vpop.f32.mrf.mxu2 }
 0x345   : > { %1823 = vxpose.xlu2.b32.cont [4/16] (narrow) %v1749_v0, 8  ;;  %v1716_v45 = vpop.f32.mrf.mxu1 }
 0x346   : > { %v1701_v19 = vpop.f32.mrf.mxu0 }
 0x347   : > { %1791 = vxpose.xlu1.b32.cont [4/16] (narrow) %v1701_v19, 8 }
 0x353   : > { %v1752_v29 = vpop.f32.mrf.mxu2 }
 0x354   : > { %1824 = vxpose.xlu2.b32.cont [5/16] (narrow) %v1752_v29, 8 }
 0x355   : > { %v1704_v33 = vpop.f32.mrf.mxu0  ;;  %v1767_v14 = vpop.f32.mrf.mxu3 }
 0x356   : > { %1792 = vxpose.xlu1.b32.cont [5/16] (narrow) %v1704_v33, 8 }
 0x357   : > { %v1719_v22 = vpop.f32.mrf.mxu1 }
 0x35d   : > { %v1707_v6 = vpop.f32.mrf.mxu0 }
 0x35e   : > { %1793 = vxpose.xlu1.b32.cont [6/16] (narrow) %v1707_v6, 8 }
 0x365   : > { %v1755_v31 = vpop.f32.mrf.mxu2 }
 0x366   : > { %1825 = vxpose.xlu2.b32.cont [6/16] (narrow) %v1755_v31, 8 }
 0x36c   : > { %v1770_v25 = vpop.f32.mrf.mxu3 }
 0x36e   : > { %v1722_v18 = vpop.f32.mrf.mxu1 }
 0x37b   : > { %v1773_v8 = vpop.f32.mrf.mxu3 }
 0x37c   : > { %v1758_v63 = vpop.f32.mrf.mxu2 }
 0x37d   : > { %1826 = vxpose.xlu2.b32.cont [7/16] (narrow) %v1758_v63, 8  ;;  %v1725_v23 = vpop.f32.mrf.mxu1 }
 0x37e   : > { %v1710_v10 = vpop.f32.mrf.mxu0 }
 0x37f   : > { %1794 = vxpose.xlu1.b32.cont [7/16] (narrow) %v1710_v10, 8 }
 0x38b   : > { %v1761_v13 = vpop.f32.mrf.mxu2 }
 0x38c   : > { %1827 = vxpose.xlu2.b32.cont [8/16] (narrow) %v1761_v13, 8 }
 0x38d   : > { %v1776_v30 = vpop.f32.mrf.mxu3 }
 0x38f   : > { %v1713_v20 = vpop.f32.mrf.mxu0 }
 0x390   : > { %1795 = vxpose.xlu1.b32.cont [8/16] (narrow) %v1713_v20, 8 }
 0x394   : > { %1828 = vxpose.xlu2.b32.cont [9/16] (narrow) %v1764_v57, 8 }
 0x396   : > { %v1728_v37 = vpop.f32.mrf.mxu1 }
 0x398   : > { %1796 = vxpose.xlu1.b32.cont [9/16] (narrow) %v1716_v45, 8 }
 0x39c   : > { %1829 = vxpose.xlu2.b32.cont [10/16] (narrow) %v1767_v14, 8 }
 0x39d   : > { %v1779_v9 = vpop.f32.mrf.mxu3 }
 0x39f   : > { %v1731_v32 = vpop.f32.mrf.mxu1 }
 0x3a0   : > { %1797 = vxpose.xlu1.b32.cont [10/16] (narrow) %v1719_v22, 8 }
 0x3a4   : > { %1830 = vxpose.xlu2.b32.cont [11/16] (narrow) %v1770_v25, 8 }
 0x3a7   : > { %v1734_v16 = vpop.f32.mrf.mxu1 }
 0x3a8   : > { %1798 = vxpose.xlu1.b32.cont [11/16] (narrow) %v1722_v18, 8 }
 0x3ac   : > { %1831 = vxpose.xlu2.b32.cont [12/16] (narrow) %v1773_v8, 8  ;;  %v1782_v34 = vpop.f32.mrf.mxu3 }
 0x3b0   : > { %1799 = vxpose.xlu1.b32.cont [12/16] (narrow) %v1725_v23, 8 }
 0x3b4   : > { %1832 = vxpose.xlu2.b32.cont [13/16] (narrow) %v1776_v30, 8 }
 0x3b5   : > { %v1785_v47 = vpop.f32.mrf.mxu3 }
 0x3b6   : > { %v1737_v35 = vpop.f32.mrf.mxu1 }
 0x3b8   : > { %1800 = vxpose.xlu1.b32.cont [13/16] (narrow) %v1728_v37, 8 }
 0x3bc   : > { %1833 = vxpose.xlu2.b32.cont [14/16] (narrow) %v1779_v9, 8 }
 0x3c0   : > { %1801 = vxpose.xlu1.b32.cont [14/16] (narrow) %v1731_v32, 8 }
 0x3c4   : > { %1834 = vxpose.xlu2.b32.cont [15/16] (narrow) %v1782_v34, 8 }
 0x3c8   : > { %1802 = vxpose.xlu1.b32.cont [15/16] (narrow) %v1734_v16, 8 }
 0x3cc   : > { %1835 = vxpose.xlu2.b32.end [16/16] (narrow) %v1785_v47, 8 }
 0x3d0   : > { %1803 = vxpose.xlu1.b32.end [16/16] (narrow) %v1737_v35, 8 }
 0x3ed   : > { %v1836_v46 = vpop.trf.xlu2 }
 0x3ee   : > { %1853 = vst [vmem:[%s177_s14 + $0x8] sm:$0xff] %v1836_v46  ;;  %v1859_v49 = vmul.f32 %v1836_v46, %v1836_v46 }
 0x3fc   : > { %v1804_v27 = vpop.trf.xlu1 }
 0x3fd   : > { %1852 = vst [vmem:[%s177_s14] sm:$0xff] %v1804_v27  ;;  %v1854_v50 = vadd.f32 %v1836_v46, %v1804_v27  ;;  %v1858_v54 = vmul.f32 %v1804_v27, %v1804_v27 }
 0x3ff   : > { %1855 = vadd.xlane.f32.xlu0 %v1854_v50  ;;  %v1860_v5 = vadd.f32 %v1859_v49, %v1858_v54 }
 0x407   : > { %1861 = vadd.xlane.f32.xlu0 %v1860_v5 }
 0x472   : > { %v1856_v4 = vpop.xlane.xlu0 %1855 }
 0x473   : > { %1865 = vst.msk [vmem:[%s181_s18] sm:$0xff] %vm1864_vm13, %v1856_v4 }
 0x47a   : > { %v1862_v56 = vpop.xlane.xlu0 %1861 }
 0x47b   : > { %1867 = vst.msk [vmem:[%s181_s18] sm:$0xff] %vm1866_vm14, %v1862_v56 }
 0x47c PF: > { %s14_s12 = sadd.s32 1, %s2037_s12  }
 0x47d   : > { %p11_p4 = scmp.ge.s32.totalorder %s14_s12, 4  }
 0x47f   :  { %13 = sbr.rel (!%p11_p4) target bundleno = 1 (0x1), region = 70 }

</bundles_post_ra>
